<compile_context>
chip_gen: v7x
topology: tpu7x:2x2x1
jax: 0.10.0
libtpu: 0.0.40
codegen_flags: <defaults>
</compile_context>

<pallas_src>
import jax
import jax.numpy as jnp
from jax.experimental import pallas as pl
from jax.experimental.pallas import tpu as pltpu

FEAT = 1024
BN_EPS = 1e-5       # nn.BatchNorm1d default eps
NORM_EPS = 1e-12    # F.normalize default eps


def projector_kernel(x_ref, w1_ref, g_ref, be_ref, w2_ref, b2_ref, o_ref, acc_ref):
    """One 256-wide hidden-feature tile of the projector head.

    x:   [B, 1024] f32 (full, resident)      w1 tile: [1024, tk] bf16
    g, be: [1, tk] f32                       w2 tile: [tk, 1024] bf16
    b2:  [1, 1024] f32 (full, resident)      acc:     [B, 1024] f32 scratch
    """
    k = pl.program_id(0)

    @pl.when(k == 0)
    def _():
        acc_ref[...] = jnp.zeros_like(acc_ref)

    # Linear 1 (this tile of output features). bf16 operands, f32 MXU accumulation.
    x_bf = x_ref[...].astype(jnp.bfloat16)
    h = jnp.dot(x_bf, w1_ref[...], preferred_element_type=jnp.float32)   # [B, tk]

    # BatchNorm1d, training-mode semantics: per-feature biased batch statistics,
    # affine folded into a single scale row.
    mean = jnp.mean(h, axis=0, keepdims=True)                            # [1, tk]
    cent = h - mean
    var = jnp.mean(cent * cent, axis=0, keepdims=True)                   # biased var
    scale = g_ref[...] * jax.lax.rsqrt(var + BN_EPS)
    hn = cent * scale + be_ref[...]

    # ReLU
    r = jnp.maximum(hn, 0.0)

    # Linear 2: accumulate this tile's contribution to the [B, 1024] output.
    acc_ref[...] += jnp.dot(r.astype(jnp.bfloat16), w2_ref[...],
                            preferred_element_type=jnp.float32)

    @pl.when(k == pl.num_programs(0) - 1)
    def _():
        y = acc_ref[...] + b2_ref[...]
        # F.normalize(y, dim=1): y / max(||y||_2, eps)  ==  y * rsqrt(max(sumsq, eps^2))
        sumsq = jnp.sum(y * y, axis=1, keepdims=True)                    # [B, 1]
        inv = jax.lax.rsqrt(jnp.maximum(sumsq, NORM_EPS * NORM_EPS))
        o_ref[...] = y * inv


def projector_head(feat, w1, gamma, beta, w2, b2, *, tk=256):
    """K-tiled pallas_call: weight chunks pipeline (DMA overlaps compute)."""
    B = feat.shape[0]
    n_k = FEAT // tk
    return pl.pallas_call(
        projector_kernel,
        out_shape=jax.ShapeDtypeStruct((B, FEAT), jnp.float32),
        grid_spec=pltpu.PrefetchScalarGridSpec(
            num_scalar_prefetch=0,
            grid=(n_k,),
            in_specs=[
                pl.BlockSpec((B, FEAT), lambda k: (0, 0)),    # x  (full, resident)
                pl.BlockSpec((FEAT, tk), lambda k: (0, k)),   # w1 column chunk
                pl.BlockSpec((1, tk), lambda k: (0, k)),      # gamma chunk
                pl.BlockSpec((1, tk), lambda k: (0, k)),      # beta chunk
                pl.BlockSpec((tk, FEAT), lambda k: (k, 0)),   # w2 row chunk
                pl.BlockSpec((1, FEAT), lambda k: (0, 0)),    # b2 (full, resident)
            ],
            out_specs=pl.BlockSpec((B, FEAT), lambda k: (0, 0)),
            scratch_shapes=[pltpu.VMEM((B, FEAT), jnp.float32)],
        ),
        compiler_params=pltpu.CompilerParams(
            dimension_semantics=("arbitrary",),
            vmem_limit_bytes=16 * 1024 * 1024,
        ),
    )(feat, w1, gamma, beta, w2, b2)


def init_params(key):
    """Deterministic init matching nn.Linear / nn.BatchNorm1d defaults.

    w1/w2 are stored [in, out] (pre-transposed vs PyTorch's [out, in]) and cast to
    bfloat16 for HBM-bandwidth; biases / BN affine stay f32. Linear-1 bias is omitted
    because the following BatchNorm recenters per feature and cancels it exactly.
    """
    k1, k3, k4 = jax.random.split(key, 3)
    bound = 1.0 / jnp.sqrt(jnp.float32(FEAT))
    w1 = jax.random.uniform(k1, (FEAT, FEAT), jnp.float32, -bound, bound).astype(jnp.bfloat16)
    w2 = jax.random.uniform(k3, (FEAT, FEAT), jnp.float32, -bound, bound).astype(jnp.bfloat16)
    b2 = jax.random.uniform(k4, (1, FEAT), jnp.float32, -bound, bound)
    # nn.BatchNorm1d(1024): gamma = 1, beta = 0.
    gamma = jnp.ones((1, FEAT), jnp.float32)
    beta = jnp.zeros((1, FEAT), jnp.float32)
    return w1, gamma, beta, w2, b2


def encoder_image_standin(image, key):
    # TODO(synk): the Swin-B transformer backbone (self.encoder_image) has no compact
    # Pallas translation here; a fixed deterministic linear map stands in for it and
    # produces the [B, 1024] feature that swin_b (head removed) would output.
    B = image.shape[0]
    flat = image.reshape(B, -1).astype(jnp.float32)
    w_enc = jax.random.normal(key, (flat.shape[1], FEAT), jnp.float32)
    w_enc = w_enc / jnp.sqrt(jnp.float32(flat.shape[1]))
    return flat @ w_enc


def rank_swin_forward(image, params, enc_key):
    feat = encoder_image_standin(image, enc_key)        # [B, 1024]  (encoder glue)
    return projector_head(feat, *params)                # Pallas hot path


if __name__ == "__main__":
    key = jax.random.PRNGKey(0)
    k_img, k_enc, k_par = jax.random.split(key, 3)

    # NCHW image input, small shapes; batch = 8 so BatchNorm batch stats are meaningful
    # and the [B, 1024] feature tile is (8, 128)-aligned.
    image = jax.random.normal(k_img, (8, 3, 16, 16), dtype=jnp.float32)
    params = init_params(k_par)

    out = rank_swin_forward(image, params, k_enc)
    out = jax.block_until_ready(out)

    assert out.shape == (8, FEAT), out.shape
    # sanity: rows are unit-norm after F.normalize(dim=1)
    norms = jnp.linalg.norm(out, axis=1)
    assert bool(jnp.all(jnp.abs(norms - 1.0) < 1e-3)), norms

    print("KERNEL_OK")
</pallas_src>

<mosaic_0001>
module attributes {stable_mosaic.version = 11 : i64} {
  func.func @projector_kernel(%arg0: i32, %arg1: memref<8x1024xf32, #tpu.memory_space<vmem>>, %arg2: memref<1024x256xbf16, #tpu.memory_space<vmem>>, %arg3: memref<1x256xf32, #tpu.memory_space<vmem>>, %arg4: memref<1x256xf32, #tpu.memory_space<vmem>>, %arg5: memref<256x1024xbf16, #tpu.memory_space<vmem>>, %arg6: memref<1x1024xf32, #tpu.memory_space<vmem>>, %arg7: memref<8x1024xf32, #tpu.memory_space<vmem>>, %arg8: memref<8x1024xf32, #tpu.memory_space<vmem>>) attributes {dimension_semantics = [#tpu.dimension_semantics<arbitrary>], iteration_bounds = array<i64: 4>, scalar_prefetch = 0 : i64, scratch_operands = 1 : i64, tpu.core_type = #tpu.core_type<tc>, window_params = [{pipeline_mode = #tpu.pipeline_mode<synchronous>, transform_indices = @transform_0, window_bounds = array<i64: 8, 1024>}, {transform_indices = @transform_1, window_bounds = array<i64: 1024, 256>}, {transform_indices = @transform_2, window_bounds = array<i64: 1, 256>}, {transform_indices = @transform_3, window_bounds = array<i64: 1, 256>}, {transform_indices = @transform_4, window_bounds = array<i64: 256, 1024>}, {pipeline_mode = #tpu.pipeline_mode<synchronous>, transform_indices = @transform_5, window_bounds = array<i64: 1, 1024>}, {pipeline_mode = #tpu.pipeline_mode<synchronous>, transform_indices = @transform_6, window_bounds = array<i64: 8, 1024>}]} {
    %c0_i32 = arith.constant 0 : i32
    %0 = arith.cmpi eq, %arg0, %c0_i32 : i32
    %1 = arith.extui %0 : i1 to i32
    %c0_i32_0 = arith.constant 0 : i32
    %2 = arith.cmpi ne, %1, %c0_i32_0 : i32
    scf.if %2 {
      %cst_22 = arith.constant 0.000000e+00 : f32
      %39 = vector.broadcast %cst_22 : f32 to vector<8x1024xf32>
      %c0_23 = arith.constant 0 : index
      %c0_24 = arith.constant 0 : index
      %40 = vector.load %arg8[%c0_23, %c0_24] : memref<8x1024xf32, #tpu.memory_space<vmem>>, vector<8x1024xf32>
      tpu.vector_store %arg8[%c0_23, %c0_24], %39 {strides = array<i32>} : memref<8x1024xf32, #tpu.memory_space<vmem>>, vector<8x1024xf32>,
    } else {
    }
    %c0 = arith.constant 0 : index
    %c0_1 = arith.constant 0 : index
    %3 = vector.load %arg1[%c0, %c0_1] : memref<8x1024xf32, #tpu.memory_space<vmem>>, vector<8x1024xf32>
    %4 = arith.truncf %3 : vector<8x1024xf32> to vector<8x1024xbf16>
    %c0_2 = arith.constant 0 : index
    %c0_3 = arith.constant 0 : index
    %5 = vector.load %arg2[%c0_2, %c0_3] : memref<1024x256xbf16, #tpu.memory_space<vmem>>, vector<1024x256xbf16>
    %cst = arith.constant dense<0.000000e+00> : vector<8x256xf32>
    %6 = tpu.matmul %4, %5, %cst {dimension_numbers = #tpu.dot_dimension_numbers<[1], [0], [0], [1], [0, 0, 1, 1], [], []>} : vector<8x1024xbf16>, vector<1024x256xbf16>, vector<8x256xf32> -> vector<8x256xf32>
    %cst_4 = arith.constant dense<0.000000e+00> : vector<256xf32>
    %7 = vector.multi_reduction <add>, %6, %cst_4 [0] : vector<8x256xf32> to vector<256xf32>
    %8 = vector.shape_cast %7 : vector<256xf32> to vector<1x256xf32>
    %cst_5 = arith.constant 8.000000e+00 : f32
    %9 = vector.broadcast %cst_5 : f32 to vector<1x256xf32>
    %10 = arith.divf %8, %9 : vector<1x256xf32>
    %11 = vector.broadcast %10 : vector<1x256xf32> to vector<8x256xf32>
    %12 = arith.subf %6, %11 : vector<8x256xf32>
    %13 = arith.mulf %12, %12 : vector<8x256xf32>
    %cst_6 = arith.constant dense<0.000000e+00> : vector<256xf32>
    %14 = vector.multi_reduction <add>, %13, %cst_6 [0] : vector<8x256xf32> to vector<256xf32>
    %15 = vector.shape_cast %14 : vector<256xf32> to vector<1x256xf32>
    %cst_7 = arith.constant 8.000000e+00 : f32
    %16 = vector.broadcast %cst_7 : f32 to vector<1x256xf32>
    %17 = arith.divf %15, %16 : vector<1x256xf32>
    %c0_8 = arith.constant 0 : index
    %c0_9 = arith.constant 0 : index
    %18 = vector.load %arg3[%c0_8, %c0_9] : memref<1x256xf32, #tpu.memory_space<vmem>>, vector<1x256xf32>
    %cst_10 = arith.constant 9.99999974E-6 : f32
    %19 = vector.broadcast %cst_10 : f32 to vector<1x256xf32>
    %20 = arith.addf %17, %19 : vector<1x256xf32>
    %21 = math.rsqrt %20 : vector<1x256xf32>
    %22 = arith.mulf %18, %21 : vector<1x256xf32>
    %23 = vector.broadcast %22 : vector<1x256xf32> to vector<8x256xf32>
    %24 = arith.mulf %12, %23 : vector<8x256xf32>
    %c0_11 = arith.constant 0 : index
    %c0_12 = arith.constant 0 : index
    %25 = vector.load %arg4[%c0_11, %c0_12] : memref<1x256xf32, #tpu.memory_space<vmem>>, vector<1x256xf32>
    %26 = vector.broadcast %25 : vector<1x256xf32> to vector<8x256xf32>
    %27 = arith.addf %24, %26 : vector<8x256xf32>
    %cst_13 = arith.constant 0.000000e+00 : f32
    %28 = vector.broadcast %cst_13 : f32 to vector<8x256xf32>
    %29 = arith.maximumf %27, %28 : vector<8x256xf32>
    %c0_14 = arith.constant 0 : index
    %c0_15 = arith.constant 0 : index
    %30 = vector.load %arg8[%c0_14, %c0_15] : memref<8x1024xf32, #tpu.memory_space<vmem>>, vector<8x1024xf32>
    %31 = arith.truncf %29 : vector<8x256xf32> to vector<8x256xbf16>
    %c0_16 = arith.constant 0 : index
    %c0_17 = arith.constant 0 : index
    %32 = vector.load %arg5[%c0_16, %c0_17] : memref<256x1024xbf16, #tpu.memory_space<vmem>>, vector<256x1024xbf16>
    %cst_18 = arith.constant dense<0.000000e+00> : vector<8x1024xf32>
    %33 = tpu.matmul %31, %32, %cst_18 {dimension_numbers = #tpu.dot_dimension_numbers<[1], [0], [0], [1], [0, 0, 1, 1], [], []>} : vector<8x256xbf16>, vector<256x1024xbf16>, vector<8x1024xf32> -> vector<8x1024xf32>
    %34 = arith.addf %30, %33 : vector<8x1024xf32>
    %c0_19 = arith.constant 0 : index
    %c0_20 = arith.constant 0 : index
    %35 = vector.load %arg8[%c0_19, %c0_20] : memref<8x1024xf32, #tpu.memory_space<vmem>>, vector<8x1024xf32>
    tpu.vector_store %arg8[%c0_19, %c0_20], %34 {strides = array<i32>} : memref<8x1024xf32, #tpu.memory_space<vmem>>, vector<8x1024xf32>,
    %c3_i32 = arith.constant 3 : i32
    %36 = arith.cmpi eq, %arg0, %c3_i32 : i32
    %37 = arith.extui %36 : i1 to i32
    %c0_i32_21 = arith.constant 0 : i32
    %38 = arith.cmpi ne, %37, %c0_i32_21 : i32
    scf.if %38 {
      %c0_22 = arith.constant 0 : index
      %c0_23 = arith.constant 0 : index
      %39 = vector.load %arg8[%c0_22, %c0_23] : memref<8x1024xf32, #tpu.memory_space<vmem>>, vector<8x1024xf32>
      %c0_24 = arith.constant 0 : index
      %c0_25 = arith.constant 0 : index
      %40 = vector.load %arg6[%c0_24, %c0_25] : memref<1x1024xf32, #tpu.memory_space<vmem>>, vector<1x1024xf32>
      %41 = vector.broadcast %40 : vector<1x1024xf32> to vector<8x1024xf32>
      %42 = arith.addf %39, %41 : vector<8x1024xf32>
      %43 = arith.mulf %42, %42 : vector<8x1024xf32>
      %cst_26 = arith.constant dense<0.000000e+00> : vector<8xf32>
      %44 = vector.multi_reduction <add>, %43, %cst_26 [1] : vector<8x1024xf32> to vector<8xf32>
      %45 = vector.shape_cast %44 : vector<8xf32> to vector<8x1xf32>
      %cst_27 = arith.constant 1.000000e-24 : f32
      %46 = vector.broadcast %cst_27 : f32 to vector<8x1xf32>
      %47 = arith.maximumf %45, %46 : vector<8x1xf32>
      %48 = math.rsqrt %47 : vector<8x1xf32>
      %49 = vector.broadcast %48 : vector<8x1xf32> to vector<8x1024xf32>
      %50 = arith.mulf %42, %49 : vector<8x1024xf32>
      %c0_28 = arith.constant 0 : index
      %c0_29 = arith.constant 0 : index
      %51 = vector.load %arg7[%c0_28, %c0_29] : memref<8x1024xf32, #tpu.memory_space<vmem>>, vector<8x1024xf32>
      tpu.vector_store %arg7[%c0_28, %c0_29], %50 {strides = array<i32>} : memref<8x1024xf32, #tpu.memory_space<vmem>>, vector<8x1024xf32>,
    } else {
    }
    return
  }
  func.func @transform_0(%arg0: i32) -> (i32, i32) {
    %c0_i32 = arith.constant 0 : i32
    %c0_i32_0 = arith.constant 0 : i32
    %c0_i32_1 = arith.constant 0 : i32
    return %c0_i32, %c0_i32_0 : i32, i32
  }
  func.func @transform_1(%arg0: i32) -> (i32, i32) {
    %c0_i32 = arith.constant 0 : i32
    %c0_i32_0 = arith.constant 0 : i32
    return %c0_i32, %arg0 : i32, i32
  }
  func.func @transform_2(%arg0: i32) -> (i32, i32) {
    %c0_i32 = arith.constant 0 : i32
    %c0_i32_0 = arith.constant 0 : i32
    return %c0_i32, %arg0 : i32, i32
  }
  func.func @transform_3(%arg0: i32) -> (i32, i32) {
    %c0_i32 = arith.constant 0 : i32
    %c0_i32_0 = arith.constant 0 : i32
    return %c0_i32, %arg0 : i32, i32
  }
  func.func @transform_4(%arg0: i32) -> (i32, i32) {
    %c0_i32 = arith.constant 0 : i32
    %c0_i32_0 = arith.constant 0 : i32
    return %arg0, %c0_i32 : i32, i32
  }
  func.func @transform_5(%arg0: i32) -> (i32, i32) {
    %c0_i32 = arith.constant 0 : i32
    %c0_i32_0 = arith.constant 0 : i32
    %c0_i32_1 = arith.constant 0 : i32
    return %c0_i32, %c0_i32_0 : i32, i32
  }
  func.func @transform_6(%arg0: i32) -> (i32, i32) {
    %c0_i32 = arith.constant 0 : i32
    %c0_i32_0 = arith.constant 0 : i32
    %c0_i32_1 = arith.constant 0 : i32
    return %c0_i32, %c0_i32_0 : i32, i32
  }
}

</mosaic_0001>

<bundles_post_ra>
// kernel: tpu_custom_call.1
= control target key start
LH: loop header
LB: loop body
LE: loop exit
PB: predicated region body
PF: predicated region fallthrough
CT: control target
= control target key end

     0   :  { %s4159_s0 = inlined_call_operand.hbm [shape: f32[8,1024], index: 0, kind: input, shape index: {}]   ;;  %s4160_s1 = inlined_call_operand.hbm [shape: bf16[1024,1024], index: 1, kind: input, shape index: {}]   ;;  %s4161_s2 = inlined_call_operand.hbm [shape: f32[1,1024], index: 2, kind: input, shape index: {}]   ;;  %s4162_s3 = inlined_call_operand.hbm [shape: f32[1,1024], index: 3, kind: input, shape index: {}]   ;;  %s4163_s4 = inlined_call_operand.hbm [shape: bf16[1024,1024], index: 4, kind: input, shape index: {}]   ;;  %s4164_s5 = inlined_call_operand.hbm [shape: f32[1,1024], index: 5, kind: input, shape index: {}]   ;;  %s4165_s6 = inlined_call_operand.hbm [shape: f32[8,1024], index: 6, kind: output, shape index: {}]  }
   0x1   :  { %4174 = sst [smem:[#allocation21_spill]] %s4160_s1 }
   0x2   :  { %4175 = sst [smem:[#allocation22_spill]] %s4162_s3 }
   0x3   :  { %11 = vsyncpa [#allocation4], 0 }
   0x4   :  { %12 = vsyncpa [#allocation7], 0 }
   0x5   :  { %14 = vsyncpa [#allocation7 + $0x1], 0 }
   0x6   :  { %15 = vsyncpa [#allocation10], 0 }
   0x7   :  { %17 = vsyncpa [#allocation10 + $0x1], 0 }
   0x8   :  { %18 = vsyncpa [#allocation13], 0 }
   0x9   :  { %19 = vsyncpa [#allocation5], 0  ;;  %s3534_s21 = smov 0   ;;  %s3536_s22 = smov 0  }
   0xa   :  { %s3538_s23 = smov 0   ;;  %s3540_s24 = smov 0  }
   0xb LB: > { %s3555_s25 = sadd.s32 1, %s3484_s24   ;;  %s53_s26 = sadd.s32 1, %s3480_s23  ;;  %s3484_s24 = sphi %s3540_s24, %s4200_s24   ;;  %s3480_s23 = sphi %s3538_s23, %s4199_s23   ;;  %s3476_s22 = sphi %s3536_s22, %s4198_s22   ;;  %s3472_s21 = sphi %s3534_s21, %s4197_s21  }
   0xc   : > { %s50_s27 = ssub.s32 %s3484_s24, %s3555_s25  ;;  %p60_p0 = scmp.ne.s32.totalorder %s3480_s23, %s3476_s22 }
   0xd   : > { %p51_p1 = scmp.eq.s32.totalorder %s50_s27, 0  ;;  %p61_p2 = scmp.eq.s32.totalorder %s3484_s24, 0 }
   0xe   : > { %p2988_p3 = scmp.lt.s32.totalorder %s3484_s24, 4  ;;  %s4166_s29 = sand.u32 1, %s3484_s24  }
   0xf   : > { %s3565_s28 = scalar_select %p51_p1, %s3480_s23, %s53_s26  }
  0x10   : > { %p62_p4 = por %p61_p2, %p60_p0  ;;  %s234_s30 = sand.u32 1, %s3480_s23  }
  0x11   : > { %4176 = sst [smem:[#allocation20_spill]] %s3565_s28  ;;  %s3569_s7 = sshll.u32 %s234_s30, 10 }
  0x12   : > { %s2929_s8 = sshll.u32 %s3484_s24, 7  ;;  %s4177_s1 = sld [smem:[#allocation21_spill]] }
  0x13   : > { %s236_s12 = scalar_lea.vmem [#allocation6], %s3569_s7  ;;  %p3578_p5 = pnand %p2988_p3, %p62_p4 }
  0x14   : > { %s243_s13 = sshll.u32 %s236_s12, 4  ;;  %s3584_s15 = sshll.u32 %s234_s30, 1  ;;  %s3582_s13 = int_to_ptr.vmem [resolvable:$true] %s243_s13 }
  0x15   : > { %s4178_s14 = scalar_select %p3578_p5, 1, 0 }
  0x16   : > { %s3588_s16 = scalar_lea.sflag [#allocation7], %s4166_s29  ;;  %p3594_p7 = pneg %p3578_p5 }
  0x18   : > { %s3575_s11 = scalar_lea.hbm %s4177_s1, %s2929_s8  ;;  %s3237_s26 = scalar_lea.hbm %s4177_s1, 65536 }
  0x19   : > { %s3232_s17 = scalar_lea.hbm %s3575_s11, 16384  ;;  %p3238_p10 = scmp.lt.u32.totalorder %s3575_s11, %s4177_s1 }
  0x1a   : > { %p3233_p6 = scmp.ne.s32.totalorder %s3575_s11, %s3232_s17  ;;  %p3239_p11 = scmp.lt.u32.totalorder %s3237_s26, %s3232_s17 }
  0x1b   : > { %p3241_p13 = scmp.lt.u32.totalorder %s3232_s17, %s3575_s11 }
  0x1c   : > { %p3235_p8 = pnand %p3594_p7, %p3233_p6  ;;  %p3240_p12 = por %p3239_p11, %p3238_p10 }
  0x1e   : > { %p3236_p9 = pneg %p3235_p8  ;;  %p3242_p0 = por %p3241_p13, %p3240_p12 }
  0x20   : > { %p3243_p1 = pnand %p3242_p0, %p3236_p9 }
  0x22   : > { %3246 = shalt.err (!%p3243_p1)
}
  0x23   : > { %s3247_s8 = scalar_lea.vmem %s3582_s13, 16384  ;;  %s3486_s9 = smov [#allocation6]  }
  0x24   : > { %p3248_p2 = scmp.ne.s32.totalorder %s3582_s13, %s3247_s8  ;;  %s3252_s10 = sshll.u32 %s3486_s9, 4  ;;  %s3253_s10 = int_to_ptr.vmem [resolvable:$false] %s3252_s10 }
  0x25   : > { %s3254_s12 = scalar_lea.vmem %s3253_s10, 32768  ;;  %p3255_p6 = scmp.lt.s32.totalorder %s3582_s13, %s3253_s10 }
  0x26   : > { %p3250_p3 = pnand %p3248_p2, %p3594_p7  ;;  %p3256_p8 = scmp.lt.s32.totalorder %s3254_s12, %s3247_s8 }
  0x28   : > { %p3251_p4 = pneg %p3250_p3  ;;  %p3257_p10 = por %p3256_p8, %p3255_p6 }
  0x2a   : > { %p3258_p11 = pnand %p3257_p10, %p3251_p4 }
  0x2c   : > { %3261 = shalt.err (!%p3258_p11)
}
  0x2d   : > { %s4169_s17 = smov 512   ;;  %s3488_s19 = smov 128  }
  0x2e   : > { %s3489_s20 = smov 8   ;;  %s2930_s26 = sshll.u32 %s3484_s24, 5 }
  0x2f   : > { %2976 = dma.hbm_to_vmem [thread:$0]  (!%p3578_p5), %s3575_s11, 16384, %s3582_s13, %s3588_s16, %s4169_s17, %s3488_s19, %s3489_s20  }
  0x30   : > { %s3623_s8 = scalar_lea.hbm %s4161_s2, %s2930_s26  ;;  %s4180_s3 = sld [smem:[#allocation22_spill]] }
  0x31   : > { %s276_s29 = scalar_lea.vmem [#allocation9], %s3584_s15  ;;  %s4181_s28 = sand.u32 1, %s3484_s24  }
  0x32   : > { %s284_s1 = sshll.u32 %s276_s29, 4  ;;  %s3633_s11 = scalar_lea.sflag [#allocation10], %s4181_s28  ;;  %s285_s1 = int_to_ptr.vmem [resolvable:$true] %s284_s1 }
  0x36   : > { %s3628_s12 = scalar_lea.hbm %s4180_s3, %s2930_s26  ;;  %s3267_s26 = scalar_lea.hbm %s4180_s3, 128 }
  0x37   : > { %s3262_s13 = scalar_lea.hbm %s3628_s12, 32  ;;  %p3268_p0 = scmp.lt.u32.totalorder %s3628_s12, %s4180_s3 }
  0x38   : > { %p3263_p9 = scmp.ne.s32.totalorder %s3628_s12, %s3262_s13  ;;  %p3269_p1 = scmp.lt.u32.totalorder %s3267_s26, %s3262_s13 }
  0x39   : > { %p3271_p3 = scmp.lt.u32.totalorder %s3262_s13, %s3628_s12 }
  0x3a   : > { %p3265_p12 = pnand %p3263_p9, %p3594_p7  ;;  %p3270_p2 = por %p3269_p1, %p3268_p0 }
  0x3c   : > { %p3266_p13 = pneg %p3265_p12  ;;  %p3272_p4 = por %p3271_p3, %p3270_p2 }
  0x3e   : > { %p3273_p6 = pnand %p3272_p4, %p3266_p13 }
  0x40   : > { %3276 = shalt.err (!%p3273_p6)
}
  0x41   : > { %s3277_s28 = scalar_lea.vmem %s285_s1, 32  ;;  %s3490_s29 = smov [#allocation9]  }
  0x42   : > { %p3278_p8 = scmp.ne.s32.totalorder %s285_s1, %s3277_s28  ;;  %s3282_s9 = sshll.u32 %s3490_s29, 4  ;;  %s3283_s9 = int_to_ptr.vmem [resolvable:$false] %s3282_s9 }
  0x43   : > { %s3284_s10 = scalar_lea.vmem %s3283_s9, 64  ;;  %p3285_p9 = scmp.lt.s32.totalorder %s285_s1, %s3283_s9 }
  0x44   : > { %p3280_p10 = pnand %p3278_p8, %p3594_p7  ;;  %p3286_p12 = scmp.lt.s32.totalorder %s3284_s10, %s3277_s28 }
  0x46   : > { %p3281_p11 = pneg %p3280_p10  ;;  %p3287_p5 = por %p3286_p12, %p3285_p9 }
  0x48   : > { %p3288_p0 = pnand %p3287_p5, %p3281_p11 }
  0x4a   : > { %3291 = shalt.err (!%p3288_p0)
}
  0x4b   : > { %p4182_p1 = scmp.ne.s32.totalorder %s4178_s14, 0  ;;  %s3654_s13 = sadd.s32 4294967295, %s3484_s24  }
  0x4c   : > { %p66_p13 = scmp.ne.s32.totalorder %s3476_s22, %s3472_s21  ;;  %p4170_p5 = scmp.eq.s32.totalorder %s3654_s13, 0 }
  0x4d   : > { %2982 = dma.hbm_to_vmem [thread:$0]  (!%p4182_p1), %s3628_s12, 32, %s285_s1, %s3633_s11  }
  0x4e   : > { %p2643_p2 = scmp.ge.s32.totalorder %s3484_s24, 1  ;;  %p197_p3 = scmp.lt.s32.totalorder %s3484_s24, 5 }
  0x4f   : > { %p3664_p6 = por %p4170_p5, %p66_p13  ;;  %s3491_s12 = smov [#allocation3]  }
  0x50   : > { %p3668_p8 = pnand %p2643_p2, %p197_p3  ;;  %s210_s21 = sshll.u32 %s3491_s12, 4  ;;  %s3672_s21 = int_to_ptr.vmem [resolvable:$true] %s210_s21 }
  0x51   : > { %s4183_s19 = scalar_select %p3664_p6, 1, 0 }
  0x52   : > { %s4184_s1 = scalar_select %p3668_p8, 1, 0 }
  0x53   : > { %p2966_p10 = pneg %p3668_p8  ;;  %s3492_s20 = smov [#allocation12]  }
  0x54   : > { %s221_s26 = sshll.u32 %s3492_s20, 4  ;;  %s257_s27 = scalar_lea.vmem [#allocation8], %s3584_s15  ;;  %s3676_s26 = int_to_ptr.vmem [resolvable:$true] %s221_s26 }
  0x55   : > { %s265_s30 = sshll.u32 %s257_s27, 4  ;;  %p3681_p11 = pnand %p2966_p10, %p4170_p5  ;;  %s266_s30 = int_to_ptr.vmem [resolvable:$true] %s265_s30 }
  0x56   : > { %s3292_s29 = scalar_lea.hbm %s3623_s8, 32  ;;  %s3297_s12 = scalar_lea.hbm %s4161_s2, 128 }
  0x57   : > { %s4185_s28 = scalar_select %p3681_p11, 1, 0 }
  0x58   : > { %p3293_p9 = scmp.ne.s32.totalorder %s3623_s8, %s3292_s29  ;;  %p3298_p13 = scmp.lt.u32.totalorder %s3623_s8, %s4161_s2 }
  0x59   : > { %p3299_p2 = scmp.lt.u32.totalorder %s3297_s12, %s3292_s29  ;;  %p3301_p10 = scmp.lt.u32.totalorder %s3292_s29, %s3623_s8 }
  0x5a   : > { %p3295_p12 = pnand %p3293_p9, %p3594_p7 }
  0x5b   : > { %p3300_p3 = por %p3299_p2, %p3298_p13 }
  0x5c   : > { %p3296_p0 = pneg %p3295_p12 }
  0x5d   : > { %p3302_p4 = por %p3301_p10, %p3300_p3 }
  0x5f   : > { %p3303_p5 = pnand %p3302_p4, %p3296_p0 }
  0x61   : > { %3306 = shalt.err (!%p3303_p5)
}
  0x62   : > { %s3307_s15 = scalar_lea.vmem %s266_s30, 32  ;;  %s3493_s27 = smov [#allocation8]  }
  0x63   : > { %p3308_p6 = scmp.ne.s32.totalorder %s266_s30, %s3307_s15  ;;  %s3312_s3 = sshll.u32 %s3493_s27, 4  ;;  %s3313_s3 = int_to_ptr.vmem [resolvable:$false] %s3312_s3 }
  0x64   : > { %s3314_s9 = scalar_lea.vmem %s3313_s3, 64  ;;  %p3315_p8 = scmp.lt.s32.totalorder %s266_s30, %s3313_s3 }
  0x65   : > { %p3310_p9 = pnand %p3308_p6, %p3594_p7  ;;  %p3316_p11 = scmp.lt.s32.totalorder %s3314_s9, %s3307_s15 }
  0x67   : > { %p3311_p12 = pneg %p3310_p9  ;;  %p3317_p1 = por %p3316_p11, %p3315_p8 }
  0x69   : > { %p3318_p2 = pnand %p3317_p1, %p3311_p12 }
  0x6b   : > { %3321 = shalt.err (!%p3318_p2)
}
  0x6c   : > { %p4186_p13 = scmp.ne.s32.totalorder %s4178_s14, 0  ;;  %s3322_s10 = scalar_lea.hbm %s4159_s0, 1024 }
  0x6d   : > { %p3323_p5 = scmp.ne.s32.totalorder %s4159_s0, %s3322_s10  ;;  %p4187_p4 = scmp.ne.s32.totalorder %s4185_s28, 0 }
  0x6e   : > { %2979 = dma.hbm_to_vmem [thread:$0]  (!%p4186_p13), %s3623_s8, 32, %s266_s30, %s3588_s16  }
  0x6f   : > { %p3324_p6 = pneg %p4187_p4  ;;  %p3329_p11 = scmp.lt.u32.totalorder %s3322_s10, %s4159_s0 }
  0x71   : > { %p3325_p1 = pnand %p3324_p6, %p3323_p5 }
  0x73   : > { %p3326_p8 = pneg %p3325_p1 }
  0x75   : > { %p3331_p0 = pnand %p3329_p11, %p3326_p8 }
  0x77   : > { %3334 = shalt.err (!%p3331_p0)
}
  0x78   : > { %s3335_s16 = scalar_lea.vmem %s3672_s21, 1024  ;;  %p3343_p12 = scmp.lt.s32.totalorder %s3672_s21, %s3672_s21 }
  0x79   : > { %p3336_p3 = scmp.ne.s32.totalorder %s3672_s21, %s3335_s16  ;;  %p3344_p2 = scmp.lt.s32.totalorder %s3335_s16, %s3335_s16 }
  0x7b   : > { %p3338_p10 = pnand %p3336_p3, %p3324_p6  ;;  %p3345_p5 = por %p3344_p2, %p3343_p12 }
  0x7d   : > { %p3339_p9 = pneg %p3338_p10 }
  0x7f   : > { %p3346_p1 = pnand %p3345_p5, %p3339_p9 }
  0x81   : > { %3349 = shalt.err (!%p3346_p1)
}
  0x82   : > { %2969 = dma.hbm_to_vmem [thread:$0]  (!%p4187_p4), %s4159_s0, 1024, %s3672_s21, [#allocation4]  }
  0x83   : > { %s3350_s17 = scalar_lea.hbm %s4164_s5, 128 }
  0x84   : > { %p3351_p8 = scmp.ne.s32.totalorder %s4164_s5, %s3350_s17  ;;  %p3357_p3 = scmp.lt.u32.totalorder %s3350_s17, %s4164_s5 }
  0x86   : > { %p3353_p11 = pnand %p3351_p8, %p3324_p6 }
  0x88   : > { %p3354_p0 = pneg %p3353_p11 }
  0x8a   : > { %p3359_p10 = pnand %p3357_p3, %p3354_p0 }
  0x8c   : > { %3362 = shalt.err (!%p3359_p10)
}
  0x8d   : > { %s3363_s21 = scalar_lea.vmem %s3676_s26, 128  ;;  %p3371_p5 = scmp.lt.s32.totalorder %s3676_s26, %s3676_s26 }
  0x8e   : > { %p3364_p9 = scmp.ne.s32.totalorder %s3676_s26, %s3363_s21  ;;  %p3372_p1 = scmp.lt.s32.totalorder %s3363_s21, %s3363_s21 }
  0x90   : > { %p3366_p12 = pnand %p3364_p9, %p3324_p6  ;;  %p3373_p8 = por %p3372_p1, %p3371_p5 }
  0x92   : > { %p3367_p2 = pneg %p3366_p12 }
  0x94   : > { %p3374_p11 = pnand %p3373_p8, %p3367_p2 }
  0x96   : > { %3377 = shalt.err (!%p3374_p11)
}
  0x97   : > { %2972 = dma.hbm_to_vmem [thread:$0]  (!%p4187_p4), %s4164_s5, 128, %s3676_s26, [#allocation13]  }
  0x98   : > { %s2933_s16 = sshll.u32 %s3484_s24, 14  ;;  %s295_s8 = scalar_lea.vmem [#allocation11], %s3569_s7 }
  0x99   : > { %s303_s30 = sshll.u32 %s295_s8, 4  ;;  %s3760_s17 = scalar_lea.hbm %s4163_s4, %s2933_s16  ;;  %s3762_s30 = int_to_ptr.vmem [resolvable:$true] %s303_s30 }
  0x9a   : > { %s3378_s28 = scalar_lea.hbm %s3760_s17, 16384  ;;  %s3383_s7 = scalar_lea.hbm %s4163_s4, 65536 }
  0x9b   : > { %p3379_p6 = scmp.ne.s32.totalorder %s3760_s17, %s3378_s28  ;;  %p3384_p4 = scmp.lt.u32.totalorder %s3760_s17, %s4163_s4 }
  0x9c   : > { %p3385_p10 = scmp.lt.u32.totalorder %s3383_s7, %s3378_s28  ;;  %p3387_p12 = scmp.lt.u32.totalorder %s3378_s28, %s3760_s17 }
  0x9d   : > { %p3381_p0 = pnand %p3379_p6, %p3594_p7 }
  0x9e   : > { %p3386_p9 = por %p3385_p10, %p3384_p4 }
  0x9f   : > { %p3382_p3 = pneg %p3381_p0 }
  0xa0   : > { %p3388_p2 = por %p3387_p12, %p3386_p9 }
  0xa2   : > { %p3389_p5 = pnand %p3388_p2, %p3382_p3 }
  0xa4   : > { %3392 = shalt.err (!%p3389_p5)
}
  0xa5   : > { %s3393_s12 = scalar_lea.vmem %s3762_s30, 16384  ;;  %s3494_s20 = smov [#allocation11]  }
  0xa6   : > { %p3394_p1 = scmp.ne.s32.totalorder %s3762_s30, %s3393_s12  ;;  %s3398_s21 = sshll.u32 %s3494_s20, 4  ;;  %s3399_s21 = int_to_ptr.vmem [resolvable:$false] %s3398_s21 }
  0xa7   : > { %s3400_s3 = scalar_lea.vmem %s3399_s21, 32768  ;;  %p3401_p6 = scmp.lt.s32.totalorder %s3762_s30, %s3399_s21 }
  0xa8   : > { %p3396_p8 = pnand %p3394_p1, %p3594_p7  ;;  %p3402_p0 = scmp.lt.s32.totalorder %s3400_s3, %s3393_s12 }
  0xaa   : > { %p3397_p11 = pneg %p3396_p8  ;;  %p3403_p4 = por %p3402_p0, %p3401_p6 }
  0xac   : > { %p3404_p10 = pnand %p3403_p4, %p3397_p11 }
  0xae   : > { %3407 = shalt.err (!%p3404_p10)
}
  0xaf   : > { %s3495_s15 = smov 32   ;;  %s4188_s16 = smov 512  }
  0xb0   : > { %2985 = dma.hbm_to_vmem [thread:$0]  (!%p4186_p13), %s3760_s17, 16384, %s3762_s30, %s3633_s11, %s4188_s16, %s4188_s16, %s3495_s15  }
  0xb1   : > { %p4189_p7 = scmp.ne.s32.totalorder %s4184_s1, 0 }
  0xb2   : > { %p4190_p3 = scmp.eq.s32.totalorder (!%p4189_p7), %s3654_s13, 0 }
  0xb3   : > { %315 = sbr.rel (%p4189_p7) target bundleno = 1349 (0x545), region = 44 }
  0xba   : > { %3451 = dma.done.wait (%p4190_p3), [#allocation4], 1024   ;;  %p4191_p9 = pmov %p4190_p3 }
  0xbb   : > { %s321_s18 = sand.u32 1, %s3654_s13   ;;  %s323_s14 = sand.u32 1, %s3476_s22  }
  0xbc   : > { %3453 = vsyncadd (%p4191_p9), [#allocation4], 4294966272  ;;  %s2662_s8 = sshll.u32 %s323_s14, 10  ;;  %s322_s27 = scalar_lea.sflag [#allocation7], %s321_s18 }
  0xbd   : > { %s3796_s9 = scalar_lea.vmem [#allocation6], %s2662_s8  ;;  %p4192_p12 = scmp.ne.s32.totalorder %s4183_s19, 0 }
  0xbf   : > { %3455 = dma.done.wait (%p4192_p12), %s322_s27, 16416  }
  0xc0   : > { %3457 = vsyncadd (%p4192_p12), %s322_s27, 4294950880  ;;  %s3802_s11 = sshll.u32 %s323_s14, 1  ;;  %s340_s30 = scalar_lea.sflag [#allocation10], %s321_s18 }
  0xc1   : > { %s334_s1 = scalar_lea.vmem [#allocation8], %s3802_s11  ;;  %s343_s17 = scalar_lea.vmem [#allocation9], %s3802_s11 }
  0xc2   : > { %3459 = dma.done.wait (%p4192_p12), %s340_s30, 16416  }
  0xc3   : > { %3461 = vsyncadd (%p4192_p12), %s340_s30, 4294950880  ;;  %s3810_s28 = scalar_lea.vmem [#allocation11], %s2662_s8  ;;  %p4193_p13 = pmov %p4190_p3 }
  0xc4   : > { %p4194_p2 = pmov %p4190_p3 }
  0xc5   : > { %3463 = dma.done.wait (%p4193_p13), [#allocation13], 128  }
  0xc6   : > { %3465 = vsyncadd (%p4194_p2), [#allocation13], 4294967168  ;;  %p4195_p5 = scmp.ne.s32.totalorder %s3654_s13, 0 }
  0xc7   : > { %v3496_v0 = vmov (!%p4195_p5), 0.0  }
  0xc8   : > { %402 = sbr.rel (%p4195_p5) target bundleno = 207 (0xcf), region = 72  ;;  %403 = vst [vmem:[#allocation2] sm:$0xff] (!%p4195_p5), %v3496_v0  ;;  %404 = vst [vmem:[#allocation2 + $0x8] sm:$0xff] (!%p4195_p5), %v3496_v0 }
  0xc9   : > { %405 = vst [vmem:[#allocation2 + $0x10] sm:$0xff] (!%p4195_p5), %v3496_v0  ;;  %406 = vst [vmem:[#allocation2 + $0x18] sm:$0xff] (!%p4195_p5), %v3496_v0 }
  0xca   : > { %407 = vst [vmem:[#allocation2 + $0x20] sm:$0xff] (!%p4195_p5), %v3496_v0  ;;  %408 = vst [vmem:[#allocation2 + $0x28] sm:$0xff] (!%p4195_p5), %v3496_v0 }
  0xcb   : > { %409 = vst [vmem:[#allocation2 + $0x30] sm:$0xff] (!%p4195_p5), %v3496_v0  ;;  %410 = vst [vmem:[#allocation2 + $0x38] sm:$0xff] (!%p4195_p5), %v3496_v0 }
  0xcf PF: > { %v3034_v1 = vld [vmem:[%s3796_s9 + $0x4] ss:$8 sps:$4 sm:$0xff]   ;;  %v3036_v2 = vld [vmem:[%s3796_s9] ss:$8 sps:$4 sm:$0xff]   ;;  %v3037_v3 = vld [vmem:[%s3796_s9 + $0x14] ss:$8 sps:$4 sm:$0xff]  }
  0xd0   : > { %1195 = vmatprep.subr.bf16.mxu0 %v3034_v1  ;;  %v3039_v4 = vld [vmem:[%s3796_s9 + $0x10] ss:$8 sps:$4 sm:$0xff]   ;;  %v3040_v5 = vld [vmem:[%s3796_s9 + $0x24] ss:$8 sps:$4 sm:$0xff]   ;;  %v3042_v6 = vld [vmem:[%s3796_s9 + $0x20] ss:$8 sps:$4 sm:$0xff]  }
  0xd1   : > { %1196 = vmatpush1.bf16.msra.mxu0 %v3036_v2  ;;  %v3043_v7 = vld [vmem:[%s3796_s9 + $0x34] ss:$8 sps:$4 sm:$0xff]   ;;  %v3045_v8 = vld [vmem:[%s3796_s9 + $0x30] ss:$8 sps:$4 sm:$0xff]   ;;  %v3046_v9 = vld [vmem:[%s3796_s9 + $0x44] ss:$8 sps:$4 sm:$0xff]  }
  0xd2   : > { %1197 = vmatprep.subr.bf16.mxu0 %v3037_v3  ;;  %v3048_v10 = vld [vmem:[%s3796_s9 + $0x40] ss:$8 sps:$4 sm:$0xff]   ;;  %v3049_v11 = vld [vmem:[%s3796_s9 + $0x54] ss:$8 sps:$4 sm:$0xff]   ;;  %v3051_v12 = vld [vmem:[%s3796_s9 + $0x50] ss:$8 sps:$4 sm:$0xff]  }
  0xd3   : > { %v3052_v13 = vld [vmem:[%s3796_s9 + $0x64] ss:$8 sps:$4 sm:$0xff]   ;;  %v3054_v16 = vld [vmem:[%s3796_s9 + $0x60] ss:$8 sps:$4 sm:$0xff]   ;;  %v3055_v17 = vld [vmem:[%s3796_s9 + $0x74] ss:$8 sps:$4 sm:$0xff]  }
  0xd4   : > { %v412_v14 = vld [vmem:[#allocation3 + $0x8] sm:$0xff]  ;;  %v3057_v18 = vld [vmem:[%s3796_s9 + $0x70] ss:$8 sps:$4 sm:$0xff]   ;;  %v3061_v21 = vld [vmem:[%s3796_s9 + $0x94] ss:$8 sps:$4 sm:$0xff]   ;;  %p2924_p1 = scmp.ne.s32.totalorder %s3654_s13, 3 }
  0xd5   : > { %1198 = vmatpush1.bf16.msra.mxu0 %v3039_v4  ;;  %v420_v15 = vpack.c.bf16 %v412_v14, %v412_v14  ;;  %v3058_v19 = vld [vmem:[%s3796_s9 + $0x84] ss:$8 sps:$4 sm:$0xff]   ;;  %v3060_v20 = vld [vmem:[%s3796_s9 + $0x80] ss:$8 sps:$4 sm:$0xff]   ;;  %v3063_v22 = vld [vmem:[%s3796_s9 + $0x90] ss:$8 sps:$4 sm:$0xff]  }
  0xd6   : > { %1199 = vmatprep.subr.bf16.mxu0 %v3040_v5  ;;  %v3064_v23 = vld [vmem:[%s3796_s9 + $0xa4] ss:$8 sps:$4 sm:$0xff]   ;;  %v3066_v24 = vld [vmem:[%s3796_s9 + $0xa0] ss:$8 sps:$4 sm:$0xff]   ;;  %v3067_v25 = vld [vmem:[%s3796_s9 + $0xb4] ss:$8 sps:$4 sm:$0xff]  }
  0xd7   : > { %1227 = vmatprep.mubr.bf16.mxu0 %v420_v15  ;;  %v3069_v26 = vld [vmem:[%s3796_s9 + $0xb0] ss:$8 sps:$4 sm:$0xff]   ;;  %v3070_v27 = vld [vmem:[%s3796_s9 + $0xc4] ss:$8 sps:$4 sm:$0xff]   ;;  %v3072_v28 = vld [vmem:[%s3796_s9 + $0xc0] ss:$8 sps:$4 sm:$0xff]  }
  0xd8   : > { %v3073_v29 = vld [vmem:[%s3796_s9 + $0xd4] ss:$8 sps:$4 sm:$0xff]   ;;  %v3075_v30 = vld [vmem:[%s3796_s9 + $0xd0] ss:$8 sps:$4 sm:$0xff]   ;;  %v3076_v31 = vld [vmem:[%s3796_s9 + $0xe4] ss:$8 sps:$4 sm:$0xff]  }
  0xd9   : > { %1200 = vmatpush1.bf16.msra.mxu0 %v3042_v6  ;;  %v3078_v32 = vld [vmem:[%s3796_s9 + $0xe0] ss:$8 sps:$4 sm:$0xff]   ;;  %v3079_v33 = vld [vmem:[%s3796_s9 + $0xf4] ss:$8 sps:$4 sm:$0xff]   ;;  %v3081_v34 = vld [vmem:[%s3796_s9 + $0xf0] ss:$8 sps:$4 sm:$0xff]  }
  0xda   : > { %1201 = vmatprep.subr.bf16.mxu0 %v3043_v7  ;;  %v3084_v35 = vld [vmem:[%s3796_s9 + $0x104] ss:$8 sps:$4 sm:$0xff]   ;;  %v414_v37 = vld [vmem:[#allocation3 + $0x18] sm:$0xff]  ;;  %v3082_v39 = vld [vmem:[%s3796_s9 + $0x100] ss:$8 sps:$4 sm:$0xff]  }
  0xdb   : > { %v411_v36 = vld [vmem:[#allocation3] sm:$0xff]  ;;  %v422_v40 = vpack.c.bf16 %v414_v37, %v414_v37  ;;  %v3087_v41 = vld [vmem:[%s3796_s9 + $0x114] ss:$8 sps:$4 sm:$0xff]   ;;  %v3085_v42 = vld [vmem:[%s3796_s9 + $0x110] ss:$8 sps:$4 sm:$0xff]  }
  0xdc   : > { %v419_v38 = vpack.c.bf16 %v411_v36, %v411_v36  ;;  %v3090_v43 = vld [vmem:[%s3796_s9 + $0x124] ss:$8 sps:$4 sm:$0xff]   ;;  %v3088_v44 = vld [vmem:[%s3796_s9 + $0x120] ss:$8 sps:$4 sm:$0xff]   ;;  %v3093_v45 = vld [vmem:[%s3796_s9 + $0x134] ss:$8 sps:$4 sm:$0xff]  }
  0xdd   : > { %1202 = vmatpush1.bf16.msra.mxu0 %v3045_v8  ;;  %v3091_v46 = vld [vmem:[%s3796_s9 + $0x130] ss:$8 sps:$4 sm:$0xff]   ;;  %v3096_v47 = vld [vmem:[%s3796_s9 + $0x144] ss:$8 sps:$4 sm:$0xff]   ;;  %v3094_v48 = vld [vmem:[%s3796_s9 + $0x140] ss:$8 sps:$4 sm:$0xff]  }
  0xde   : > { %1203 = vmatprep.subr.bf16.mxu0 %v3046_v9  ;;  %v3099_v49 = vld [vmem:[%s3796_s9 + $0x154] ss:$8 sps:$4 sm:$0xff]   ;;  %v3097_v50 = vld [vmem:[%s3796_s9 + $0x150] ss:$8 sps:$4 sm:$0xff]   ;;  %v3102_v51 = vld [vmem:[%s3796_s9 + $0x164] ss:$8 sps:$4 sm:$0xff]  }
  0xdf   : > { %v3100_v52 = vld [vmem:[%s3796_s9 + $0x160] ss:$8 sps:$4 sm:$0xff]   ;;  %v3105_v53 = vld [vmem:[%s3796_s9 + $0x174] ss:$8 sps:$4 sm:$0xff]   ;;  %v3103_v54 = vld [vmem:[%s3796_s9 + $0x170] ss:$8 sps:$4 sm:$0xff]  }
  0xe0   : > { %v3108_v55 = vld [vmem:[%s3796_s9 + $0x184] ss:$8 sps:$4 sm:$0xff]   ;;  %v3106_v56 = vld [vmem:[%s3796_s9 + $0x180] ss:$8 sps:$4 sm:$0xff]   ;;  %v3111_v57 = vld [vmem:[%s3796_s9 + $0x194] ss:$8 sps:$4 sm:$0xff]  }
  0xe1   : > { %1204 = vmatpush1.bf16.msra.mxu0 %v3048_v10  ;;  %v3109_v58 = vld [vmem:[%s3796_s9 + $0x190] ss:$8 sps:$4 sm:$0xff]   ;;  %v3114_v59 = vld [vmem:[%s3796_s9 + $0x1a4] ss:$8 sps:$4 sm:$0xff]   ;;  %v3112_v60 = vld [vmem:[%s3796_s9 + $0x1a0] ss:$8 sps:$4 sm:$0xff]  }
  0xe2   : > { %1205 = vmatprep.subr.bf16.mxu0 %v3049_v11  ;;  %v3117_v61 = vld [vmem:[%s3796_s9 + $0x1b4] ss:$8 sps:$4 sm:$0xff]   ;;  %v3115_v62 = vld [vmem:[%s3796_s9 + $0x1b0] ss:$8 sps:$4 sm:$0xff]   ;;  %v3120_v63 = vld [vmem:[%s3796_s9 + $0x1c4] ss:$8 sps:$4 sm:$0xff]  }
  0xe3   : > { %v3118_v0 = vld [vmem:[%s3796_s9 + $0x1c0] ss:$8 sps:$4 sm:$0xff]   ;;  %v3123_v1 = vld [vmem:[%s3796_s9 + $0x1d4] ss:$8 sps:$4 sm:$0xff]   ;;  %v3121_v2 = vld [vmem:[%s3796_s9 + $0x1d0] ss:$8 sps:$4 sm:$0xff]  }
  0xe4   : > { %v3126_v3 = vld [vmem:[%s3796_s9 + $0x1e4] ss:$8 sps:$4 sm:$0xff]   ;;  %v3124_v4 = vld [vmem:[%s3796_s9 + $0x1e0] ss:$8 sps:$4 sm:$0xff]   ;;  %v3129_v5 = vld [vmem:[%s3796_s9 + $0x1f4] ss:$8 sps:$4 sm:$0xff]  }
  0xe5   : > { %1206 = vmatpush1.bf16.msra.mxu0 %v3051_v12  ;;  %v3127_v6 = vld [vmem:[%s3796_s9 + $0x1f0] ss:$8 sps:$4 sm:$0xff]   ;;  %v3132_v8 = vld [vmem:[%s3796_s9 + $0x204] ss:$8 sps:$4 sm:$0xff]   ;;  %v3130_v11 = vld [vmem:[%s3796_s9 + $0x200] ss:$8 sps:$4 sm:$0xff]  }
  0xe6   : > { %1207 = vmatprep.subr.bf16.mxu0 %v3052_v13  ;;  %v413_v7 = vld [vmem:[#allocation3 + $0x10] sm:$0xff]  ;;  %v416_v9 = vld [vmem:[#allocation3 + $0x28] sm:$0xff] }
  0xe7   : > { %v421_v10 = vpack.c.bf16 %v413_v7, %v413_v7  ;;  %v424_v12 = vpack.c.bf16 %v416_v9, %v416_v9  ;;  %v3135_v13 = vld [vmem:[%s3796_s9 + $0x214] ss:$8 sps:$4 sm:$0xff]   ;;  %v3133_v14 = vld [vmem:[%s3796_s9 + $0x210] ss:$8 sps:$4 sm:$0xff]   ;;  %v3138_v15 = vld [vmem:[%s3796_s9 + $0x224] ss:$8 sps:$4 sm:$0xff]  }
  0xe8   : > { %v3166_v36 = vld [vmem:[%s3796_s9 + $0x2c0] ss:$8 sps:$4 sm:$0xff]   ;;  %v3171_v37 = vld [vmem:[%s3796_s9 + $0x2d4] ss:$8 sps:$4 sm:$0xff]   ;;  %v3216_v7 = vld [vmem:[%s3796_s9 + $0x3c4] ss:$8 sps:$4 sm:$0xff]  }
  0xe9   : > { %1208 = vmatpush1.bf16.msra.mxu0 %v3054_v16  ;;  %v3136_v16 = vld [vmem:[%s3796_s9 + $0x220] ss:$8 sps:$4 sm:$0xff]   ;;  %v3219_v9 = vld [vmem:[%s3796_s9 + $0x3d4] ss:$8 sps:$4 sm:$0xff]  }
  0xea   : > { %1209 = vmatprep.subr.bf16.mxu0 %v3055_v17  ;;  %v3141_v17 = vld [vmem:[%s3796_s9 + $0x234] ss:$8 sps:$4 sm:$0xff]  }
  0xed   : > { %1210 = vmatpush1.bf16.msra.mxu0 %v3057_v18  ;;  %v3139_v18 = vld [vmem:[%s3796_s9 + $0x230] ss:$8 sps:$4 sm:$0xff]  }
  0xee   : > { %1211 = vmatprep.subr.bf16.mxu0 %v3058_v19  ;;  %v3144_v19 = vld [vmem:[%s3796_s9 + $0x244] ss:$8 sps:$4 sm:$0xff]  }
  0xf1   : > { %1212 = vmatpush1.bf16.msra.mxu0 %v3060_v20  ;;  %v3142_v20 = vld [vmem:[%s3796_s9 + $0x240] ss:$8 sps:$4 sm:$0xff]  }
  0xf2   : > { %1213 = vmatprep.subr.bf16.mxu0 %v3061_v21  ;;  %v3147_v21 = vld [vmem:[%s3796_s9 + $0x254] ss:$8 sps:$4 sm:$0xff]  }
  0xf5   : > { %1214 = vmatpush1.bf16.msra.mxu0 %v3063_v22  ;;  %v3145_v22 = vld [vmem:[%s3796_s9 + $0x250] ss:$8 sps:$4 sm:$0xff]  }
  0xf6   : > { %1215 = vmatprep.subr.bf16.mxu0 %v3064_v23  ;;  %v3150_v23 = vld [vmem:[%s3796_s9 + $0x264] ss:$8 sps:$4 sm:$0xff]  }
  0xf9   : > { %1216 = vmatpush1.bf16.msra.mxu0 %v3066_v24  ;;  %v3148_v24 = vld [vmem:[%s3796_s9 + $0x260] ss:$8 sps:$4 sm:$0xff]  }
  0xfa   : > { %1217 = vmatprep.subr.bf16.mxu0 %v3067_v25  ;;  %v3153_v25 = vld [vmem:[%s3796_s9 + $0x274] ss:$8 sps:$4 sm:$0xff]  }
  0xfd   : > { %1218 = vmatpush1.bf16.msra.mxu0 %v3069_v26  ;;  %v3151_v26 = vld [vmem:[%s3796_s9 + $0x270] ss:$8 sps:$4 sm:$0xff]  }
  0xfe   : > { %1219 = vmatprep.subr.bf16.mxu0 %v3070_v27  ;;  %v3156_v27 = vld [vmem:[%s3796_s9 + $0x284] ss:$8 sps:$4 sm:$0xff]  }
 0x101   : > { %1220 = vmatpush1.bf16.msra.mxu0 %v3072_v28  ;;  %v3154_v28 = vld [vmem:[%s3796_s9 + $0x280] ss:$8 sps:$4 sm:$0xff]  }
 0x102   : > { %1221 = vmatprep.subr.bf16.mxu0 %v3073_v29  ;;  %v3159_v29 = vld [vmem:[%s3796_s9 + $0x294] ss:$8 sps:$4 sm:$0xff]  }
 0x105   : > { %1222 = vmatpush1.bf16.msra.mxu0 %v3075_v30  ;;  %v3157_v30 = vld [vmem:[%s3796_s9 + $0x290] ss:$8 sps:$4 sm:$0xff]  }
 0x106   : > { %1223 = vmatprep.subr.bf16.mxu0 %v3076_v31  ;;  %v3162_v31 = vld [vmem:[%s3796_s9 + $0x2a4] ss:$8 sps:$4 sm:$0xff]  }
 0x109   : > { %1224 = vmatpush1.bf16.msra.mxu0 %v3078_v32  ;;  %v3160_v32 = vld [vmem:[%s3796_s9 + $0x2a0] ss:$8 sps:$4 sm:$0xff]  }
 0x10a   : > { %1225 = vmatprep.subr.bf16.mxu0 %v3079_v33  ;;  %v3165_v33 = vld [vmem:[%s3796_s9 + $0x2b4] ss:$8 sps:$4 sm:$0xff]  }
 0x10d   : > { %1226 = vmatpush1.bf16.msra.mxu0 %v3081_v34  ;;  %v3163_v34 = vld [vmem:[%s3796_s9 + $0x2b0] ss:$8 sps:$4 sm:$0xff]  }
 0x10e   : > { %1236 = vmatprep.subr.bf16.mxu0 %v3084_v35  ;;  %v3168_v35 = vld [vmem:[%s3796_s9 + $0x2c4] ss:$8 sps:$4 sm:$0xff]  }
 0x110   : > { %1228 = vmatmul.mubr.bf16.vlgmr.msra.gmra.mrb[0].mxu0 %v419_v38  ;;  %v3169_v38 = vld [vmem:[%s3796_s9 + $0x2d0] ss:$8 sps:$4 sm:$0xff]  }
 0x111   : > { %1237 = vmatpush1.bf16.msra.mxu0 %v3082_v39  ;;  %1268 = vmatprep.mubr.bf16.mxu0 %v422_v40  ;;  %v3174_v39 = vld [vmem:[%s3796_s9 + $0x2e4] ss:$8 sps:$4 sm:$0xff]   ;;  %v3172_v40 = vld [vmem:[%s3796_s9 + $0x2e0] ss:$8 sps:$4 sm:$0xff]  }
 0x112   : > { %1238 = vmatprep.subr.bf16.mxu0 %v3087_v41  ;;  %v3177_v41 = vld [vmem:[%s3796_s9 + $0x2f4] ss:$8 sps:$4 sm:$0xff]  }
 0x115   : > { %1239 = vmatpush1.bf16.msra.mxu0 %v3085_v42  ;;  %v3175_v42 = vld [vmem:[%s3796_s9 + $0x2f0] ss:$8 sps:$4 sm:$0xff]  }
 0x116   : > { %1240 = vmatprep.subr.bf16.mxu0 %v3090_v43  ;;  %v415_v43 = vld [vmem:[#allocation3 + $0x20] sm:$0xff] }
 0x119   : > { %1241 = vmatpush1.bf16.msra.mxu0 %v3088_v44  ;;  %v3180_v44 = vld [vmem:[%s3796_s9 + $0x304] ss:$8 sps:$4 sm:$0xff]  }
 0x11a   : > { %1242 = vmatprep.subr.bf16.mxu0 %v3093_v45  ;;  %v418_v45 = vld [vmem:[#allocation3 + $0x38] sm:$0xff] }
 0x11d   : > { %1243 = vmatpush1.bf16.msra.mxu0 %v3091_v46  ;;  %v423_v46 = vpack.c.bf16 %v415_v43, %v415_v43 }
 0x11e   : > { %1244 = vmatprep.subr.bf16.mxu0 %v3096_v47  ;;  %v3178_v47 = vld [vmem:[%s3796_s9 + $0x300] ss:$8 sps:$4 sm:$0xff]  }
 0x121   : > { %1245 = vmatpush1.bf16.msra.mxu0 %v3094_v48  ;;  %v426_v48 = vpack.c.bf16 %v418_v45, %v418_v45  ;;  %v1511_v45 = vld [vmem:[%s3810_s28 + $0x1c0] sm:$0xff] }
 0x122   : > { %1246 = vmatprep.subr.bf16.mxu0 %v3099_v49  ;;  %v3183_v49 = vld [vmem:[%s3796_s9 + $0x314] ss:$8 sps:$4 sm:$0xff]  }
 0x125   : > { %1247 = vmatpush1.bf16.msra.mxu0 %v3097_v50  ;;  %v3181_v50 = vld [vmem:[%s3796_s9 + $0x310] ss:$8 sps:$4 sm:$0xff]  }
 0x126   : > { %1248 = vmatprep.subr.bf16.mxu0 %v3102_v51  ;;  %v3186_v51 = vld [vmem:[%s3796_s9 + $0x324] ss:$8 sps:$4 sm:$0xff]  }
 0x129   : > { %1249 = vmatpush1.bf16.msra.mxu0 %v3100_v52  ;;  %v3184_v52 = vld [vmem:[%s3796_s9 + $0x320] ss:$8 sps:$4 sm:$0xff]  }
 0x12a   : > { %1250 = vmatprep.subr.bf16.mxu0 %v3105_v53  ;;  %v3189_v53 = vld [vmem:[%s3796_s9 + $0x334] ss:$8 sps:$4 sm:$0xff]  }
 0x12d   : > { %1251 = vmatpush1.bf16.msra.mxu0 %v3103_v54  ;;  %v3187_v54 = vld [vmem:[%s3796_s9 + $0x330] ss:$8 sps:$4 sm:$0xff]  }
 0x12e   : > { %1252 = vmatprep.subr.bf16.mxu0 %v3108_v55  ;;  %v3192_v55 = vld [vmem:[%s3796_s9 + $0x344] ss:$8 sps:$4 sm:$0xff]  }
 0x131   : > { %1253 = vmatpush1.bf16.msra.mxu0 %v3106_v56  ;;  %v3190_v56 = vld [vmem:[%s3796_s9 + $0x340] ss:$8 sps:$4 sm:$0xff]  }
 0x132   : > { %1254 = vmatprep.subr.bf16.mxu0 %v3111_v57  ;;  %v3195_v57 = vld [vmem:[%s3796_s9 + $0x354] ss:$8 sps:$4 sm:$0xff]  }
 0x135   : > { %1255 = vmatpush1.bf16.msra.mxu0 %v3109_v58  ;;  %v3193_v58 = vld [vmem:[%s3796_s9 + $0x350] ss:$8 sps:$4 sm:$0xff]  }
 0x136   : > { %1256 = vmatprep.subr.bf16.mxu0 %v3114_v59  ;;  %v3198_v59 = vld [vmem:[%s3796_s9 + $0x364] ss:$8 sps:$4 sm:$0xff]  }
 0x139   : > { %1257 = vmatpush1.bf16.msra.mxu0 %v3112_v60  ;;  %v3196_v60 = vld [vmem:[%s3796_s9 + $0x360] ss:$8 sps:$4 sm:$0xff]  }
 0x13a   : > { %1258 = vmatprep.subr.bf16.mxu0 %v3117_v61  ;;  %v3201_v61 = vld [vmem:[%s3796_s9 + $0x374] ss:$8 sps:$4 sm:$0xff]  }
 0x13d   : > { %1259 = vmatpush1.bf16.msra.mxu0 %v3115_v62  ;;  %v3199_v62 = vld [vmem:[%s3796_s9 + $0x370] ss:$8 sps:$4 sm:$0xff]  }
 0x13e   : > { %1260 = vmatprep.subr.bf16.mxu0 %v3120_v63  ;;  %v3204_v63 = vld [vmem:[%s3796_s9 + $0x384] ss:$8 sps:$4 sm:$0xff]  }
 0x141   : > { %1261 = vmatpush1.bf16.msra.mxu0 %v3118_v0  ;;  %v3202_v0 = vld [vmem:[%s3796_s9 + $0x380] ss:$8 sps:$4 sm:$0xff]  }
 0x142   : > { %1262 = vmatprep.subr.bf16.mxu0 %v3123_v1  ;;  %v3207_v1 = vld [vmem:[%s3796_s9 + $0x394] ss:$8 sps:$4 sm:$0xff]  }
 0x145   : > { %1263 = vmatpush1.bf16.msra.mxu0 %v3121_v2  ;;  %v3205_v2 = vld [vmem:[%s3796_s9 + $0x390] ss:$8 sps:$4 sm:$0xff]  }
 0x146   : > { %1264 = vmatprep.subr.bf16.mxu0 %v3126_v3  ;;  %v3210_v3 = vld [vmem:[%s3796_s9 + $0x3a4] ss:$8 sps:$4 sm:$0xff]  }
 0x149   : > { %1265 = vmatpush1.bf16.msra.mxu0 %v3124_v4  ;;  %v3208_v4 = vld [vmem:[%s3796_s9 + $0x3a0] ss:$8 sps:$4 sm:$0xff]  }
 0x14a   : > { %1266 = vmatprep.subr.bf16.mxu0 %v3129_v5  ;;  %v3213_v5 = vld [vmem:[%s3796_s9 + $0x3b4] ss:$8 sps:$4 sm:$0xff]  }
 0x14d   : > { %1267 = vmatpush1.bf16.msra.mxu0 %v3127_v6  ;;  %v3211_v6 = vld [vmem:[%s3796_s9 + $0x3b0] ss:$8 sps:$4 sm:$0xff]  }
 0x14e   : > { %1277 = vmatprep.subr.bf16.mxu0 %v3132_v8  ;;  %v3214_v8 = vld [vmem:[%s3796_s9 + $0x3c0] ss:$8 sps:$4 sm:$0xff]  }
 0x150   : > { %1269 = vmatmul.mubr.bf16.vlgmr.msra.gmra.mrb[0].mxu0 %v421_v10  ;;  %v3217_v10 = vld [vmem:[%s3796_s9 + $0x3d0] ss:$8 sps:$4 sm:$0xff]  }
 0x151   : > { %1278 = vmatpush1.bf16.msra.mxu0 %v3130_v11  ;;  %1309 = vmatprep.mubr.bf16.mxu0 %v424_v12  ;;  %v3222_v11 = vld [vmem:[%s3796_s9 + $0x3e4] ss:$8 sps:$4 sm:$0xff]   ;;  %v3220_v12 = vld [vmem:[%s3796_s9 + $0x3e0] ss:$8 sps:$4 sm:$0xff]  }
 0x152   : > { %1279 = vmatprep.subr.bf16.mxu0 %v3135_v13  ;;  %v3225_v13 = vld [vmem:[%s3796_s9 + $0x3f4] ss:$8 sps:$4 sm:$0xff]  }
 0x155   : > { %1280 = vmatpush1.bf16.msra.mxu0 %v3133_v14  ;;  %v3223_v14 = vld [vmem:[%s3796_s9 + $0x3f0] ss:$8 sps:$4 sm:$0xff]  }
 0x156   : > { %1281 = vmatprep.subr.bf16.mxu0 %v3138_v15  ;;  %v417_v15 = vld [vmem:[#allocation3 + $0x30] sm:$0xff] }
 0x159   : > { %1282 = vmatpush1.bf16.msra.mxu0 %v3136_v16  ;;  %v425_v16 = vpack.c.bf16 %v417_v15, %v417_v15 }
 0x15a   : > { %1283 = vmatprep.subr.bf16.mxu0 %v3141_v17  ;;  %v1455_v17 = vld [vmem:[%s3810_s28] sm:$0xff] }
 0x15d   : > { %1284 = vmatpush1.bf16.msra.mxu0 %v3139_v18  ;;  %v1459_v18 = vld [vmem:[%s3810_s28 + $0x20] sm:$0xff] }
 0x15e   : > { %1285 = vmatprep.subr.bf16.mxu0 %v3144_v19  ;;  %v2797_v19 = vcombine.high %v1455_v17, %v1459_v18 }
 0x160   : > { %2223 = vmatprep.subr.bf16.mxu1 %v2797_v19 }
 0x161   : > { %1286 = vmatpush1.bf16.msra.mxu0 %v3142_v20  ;;  %v2796_v20 = vcombine.low %v1455_v17, %v1459_v18  ;;  %v3979_v17 = vld [vmem:[%s3810_s28 + $0x8] sm:$0xff] }
 0x162   : > { %1287 = vmatprep.subr.bf16.mxu0 %v3147_v21  ;;  %v1463_v21 = vld [vmem:[%s3810_s28 + $0x40] sm:$0xff]  ;;  %v3982_v18 = vld [vmem:[%s3810_s28 + $0x28] sm:$0xff] }
 0x163   : > { %2224 = vmatpush1.bf16.msra.mxu1 %v2796_v20  ;;  %v2799_v19 = vcombine.high %v3979_v17, %v3982_v18  ;;  %v2798_v20 = vcombine.low %v3979_v17, %v3982_v18 }
 0x165   : > { %1288 = vmatpush1.bf16.msra.mxu0 %v3145_v22  ;;  %v1467_v22 = vld [vmem:[%s3810_s28 + $0x60] sm:$0xff] }
 0x166   : > { %1289 = vmatprep.subr.bf16.mxu0 %v3150_v23  ;;  %v2805_v23 = vcombine.high %v1463_v21, %v1467_v22 }
 0x168   : > { %2225 = vmatprep.subr.bf16.mxu1 %v2805_v23 }
 0x169   : > { %1290 = vmatpush1.bf16.msra.mxu0 %v3148_v24  ;;  %v2804_v24 = vcombine.low %v1463_v21, %v1467_v22 }
 0x16a   : > { %1291 = vmatprep.subr.bf16.mxu0 %v3153_v25  ;;  %v1471_v25 = vld [vmem:[%s3810_s28 + $0x80] sm:$0xff] }
 0x16b   : > { %2226 = vmatpush1.bf16.msra.mxu1 %v2804_v24 }
 0x16d   : > { %1292 = vmatpush1.bf16.msra.mxu0 %v3151_v26  ;;  %v1475_v26 = vld [vmem:[%s3810_s28 + $0xa0] sm:$0xff] }
 0x16e   : > { %1293 = vmatprep.subr.bf16.mxu0 %v3156_v27  ;;  %v2813_v27 = vcombine.high %v1471_v25, %v1475_v26 }
 0x170   : > { %2227 = vmatprep.subr.bf16.mxu1 %v2813_v27 }
 0x171   : > { %1294 = vmatpush1.bf16.msra.mxu0 %v3154_v28  ;;  %v2812_v28 = vcombine.low %v1471_v25, %v1475_v26 }
 0x172   : > { %1295 = vmatprep.subr.bf16.mxu0 %v3159_v29  ;;  %v1479_v29 = vld [vmem:[%s3810_s28 + $0xc0] sm:$0xff] }
 0x173   : > { %2228 = vmatpush1.bf16.msra.mxu1 %v2812_v28 }
 0x175   : > { %1296 = vmatpush1.bf16.msra.mxu0 %v3157_v30  ;;  %v1483_v30 = vld [vmem:[%s3810_s28 + $0xe0] sm:$0xff] }
 0x176   : > { %1297 = vmatprep.subr.bf16.mxu0 %v3162_v31  ;;  %v2821_v31 = vcombine.high %v1479_v29, %v1483_v30 }
 0x178   : > { %2229 = vmatprep.subr.bf16.mxu1 %v2821_v31 }
 0x179   : > { %1298 = vmatpush1.bf16.msra.mxu0 %v3160_v32  ;;  %v2820_v32 = vcombine.low %v1479_v29, %v1483_v30 }
 0x17a   : > { %1299 = vmatprep.subr.bf16.mxu0 %v3165_v33  ;;  %v1487_v33 = vld [vmem:[%s3810_s28 + $0x100] sm:$0xff] }
 0x17b   : > { %2230 = vmatpush1.bf16.msra.mxu1 %v2820_v32 }
 0x17d   : > { %1300 = vmatpush1.bf16.msra.mxu0 %v3163_v34  ;;  %v1491_v34 = vld [vmem:[%s3810_s28 + $0x120] sm:$0xff] }
 0x17e   : > { %1301 = vmatprep.subr.bf16.mxu0 %v3168_v35  ;;  %v2829_v35 = vcombine.high %v1487_v33, %v1491_v34 }
 0x180   : > { %2231 = vmatprep.subr.bf16.mxu1 %v2829_v35 }
 0x181   : > { %1302 = vmatpush1.bf16.msra.mxu0 %v3166_v36  ;;  %v2828_v36 = vcombine.low %v1487_v33, %v1491_v34 }
 0x182   : > { %1303 = vmatprep.subr.bf16.mxu0 %v3171_v37  ;;  %v1495_v37 = vld [vmem:[%s3810_s28 + $0x140] sm:$0xff] }
 0x183   : > { %2232 = vmatpush1.bf16.msra.mxu1 %v2828_v36 }
 0x185   : > { %1304 = vmatpush1.bf16.msra.mxu0 %v3169_v38  ;;  %v1499_v38 = vld [vmem:[%s3810_s28 + $0x160] sm:$0xff] }
 0x186   : > { %1305 = vmatprep.subr.bf16.mxu0 %v3174_v39  ;;  %v2837_v39 = vcombine.high %v1495_v37, %v1499_v38 }
 0x188   : > { %2233 = vmatprep.subr.bf16.mxu1 %v2837_v39 }
 0x189   : > { %1306 = vmatpush1.bf16.msra.mxu0 %v3172_v40  ;;  %v2836_v40 = vcombine.low %v1495_v37, %v1499_v38 }
 0x18a   : > { %1307 = vmatprep.subr.bf16.mxu0 %v3177_v41  ;;  %v1503_v41 = vld [vmem:[%s3810_s28 + $0x180] sm:$0xff] }
 0x18b   : > { %2234 = vmatpush1.bf16.msra.mxu1 %v2836_v40 }
 0x18d   : > { %1308 = vmatpush1.bf16.msra.mxu0 %v3175_v42  ;;  %v1507_v42 = vld [vmem:[%s3810_s28 + $0x1a0] sm:$0xff] }
 0x18e   : > { %1318 = vmatprep.subr.bf16.mxu0 %v3180_v44  ;;  %v2845_v43 = vcombine.high %v1503_v41, %v1507_v42  ;;  %v2844_v44 = vcombine.low %v1503_v41, %v1507_v42 }
 0x190   : > { %1310 = vmatmul.mubr.bf16.vlgmr.msra.gmra.mrb[0].mxu0 %v423_v46  ;;  %2235 = vmatprep.subr.bf16.mxu1 %v2845_v43  ;;  %v1515_v46 = vld [vmem:[%s3810_s28 + $0x1e0] sm:$0xff] }
 0x191   : > { %1319 = vmatpush1.bf16.msra.mxu0 %v3178_v47  ;;  %1350 = vmatprep.mubr.bf16.mxu0 %v426_v48  ;;  %v2853_v47 = vcombine.high %v1511_v45, %v1515_v46  ;;  %v2852_v48 = vcombine.low %v1511_v45, %v1515_v46 }
 0x192   : > { %1320 = vmatprep.subr.bf16.mxu0 %v3183_v49  ;;  %2236 = vmatpush1.bf16.msra.mxu1 %v2844_v44  ;;  %v1519_v49 = vld [vmem:[%s3810_s28 + $0x200] sm:$0xff] }
 0x193   : > { %2237 = vmatprep.subr.bf16.mxu1 %v2853_v47 }
 0x195   : > { %1321 = vmatpush1.bf16.msra.mxu0 %v3181_v50  ;;  %v1523_v50 = vld [vmem:[%s3810_s28 + $0x220] sm:$0xff] }
 0x196   : > { %1322 = vmatprep.subr.bf16.mxu0 %v3186_v51  ;;  %2238 = vmatpush1.bf16.msra.mxu1 %v2852_v48  ;;  %v2861_v51 = vcombine.high %v1519_v49, %v1523_v50 }
 0x198   : > { %2239 = vmatprep.subr.bf16.mxu1 %v2861_v51 }
 0x199   : > { %1323 = vmatpush1.bf16.msra.mxu0 %v3184_v52  ;;  %v2860_v52 = vcombine.low %v1519_v49, %v1523_v50 }
 0x19a   : > { %1324 = vmatprep.subr.bf16.mxu0 %v3189_v53  ;;  %v1527_v53 = vld [vmem:[%s3810_s28 + $0x240] sm:$0xff] }
 0x19b   : > { %2240 = vmatpush1.bf16.msra.mxu1 %v2860_v52 }
 0x19d   : > { %1325 = vmatpush1.bf16.msra.mxu0 %v3187_v54  ;;  %v1531_v54 = vld [vmem:[%s3810_s28 + $0x260] sm:$0xff] }
 0x19e   : > { %1326 = vmatprep.subr.bf16.mxu0 %v3192_v55  ;;  %v2869_v55 = vcombine.high %v1527_v53, %v1531_v54 }
 0x1a0   : > { %2241 = vmatprep.subr.bf16.mxu1 %v2869_v55 }
 0x1a1   : > { %1327 = vmatpush1.bf16.msra.mxu0 %v3190_v56  ;;  %v2868_v56 = vcombine.low %v1527_v53, %v1531_v54 }
 0x1a2   : > { %1328 = vmatprep.subr.bf16.mxu0 %v3195_v57  ;;  %v1535_v57 = vld [vmem:[%s3810_s28 + $0x280] sm:$0xff] }
 0x1a3   : > { %2242 = vmatpush1.bf16.msra.mxu1 %v2868_v56 }
 0x1a5   : > { %1329 = vmatpush1.bf16.msra.mxu0 %v3193_v58  ;;  %v1539_v58 = vld [vmem:[%s3810_s28 + $0x2a0] sm:$0xff] }
 0x1a6   : > { %1330 = vmatprep.subr.bf16.mxu0 %v3198_v59  ;;  %v2877_v59 = vcombine.high %v1535_v57, %v1539_v58 }
 0x1a8   : > { %2243 = vmatprep.subr.bf16.mxu1 %v2877_v59  ;;  %v3497_v59 = vmov 1966171168  }
 0x1a9   : > { %1331 = vmatpush1.bf16.msra.mxu0 %v3196_v60  ;;  %v2876_v60 = vcombine.low %v1535_v57, %v1539_v58 }
 0x1aa   : > { %1332 = vmatprep.subr.bf16.mxu0 %v3201_v61  ;;  %v1543_v61 = vld [vmem:[%s3810_s28 + $0x2c0] sm:$0xff] }
 0x1ab   : > { %2244 = vmatpush1.bf16.msra.mxu1 %v2876_v60  ;;  %v1401_v60 = vunpack.c.l.s4 %v3497_v59  ;;  %v1540_v59 = vld [vmem:[%s3810_s28 + $0x2a8] sm:$0xff] }
 0x1ad   : > { %1333 = vmatpush1.bf16.msra.mxu0 %v3199_v62  ;;  %v1547_v62 = vld [vmem:[%s3810_s28 + $0x2e0] sm:$0xff] }
 0x1ae   : > { %1334 = vmatprep.subr.bf16.mxu0 %v3204_v63  ;;  %v2885_v63 = vcombine.high %v1543_v61, %v1547_v62 }
 0x1b0   : > { %2245 = vmatprep.subr.bf16.mxu1 %v2885_v63 }
 0x1b1   : > { %1335 = vmatpush1.bf16.msra.mxu0 %v3202_v0  ;;  %v2884_v0 = vcombine.low %v1543_v61, %v1547_v62  ;;  %v1403_v61 = vlaneseq  ;;  %v1402_v62 = vunpack.c.0.s8 %v1401_v60 }
 0x1b2   : > { %1336 = vmatprep.subr.bf16.mxu0 %v3207_v1  ;;  %v1551_v1 = vld [vmem:[%s3810_s28 + $0x300] sm:$0xff] }
 0x1b3   : > { %2246 = vmatpush1.bf16.msra.mxu1 %v2884_v0  ;;  %v3988_v63 = vshrl.u32 %v1403_v61, 7 }
 0x1b5   : > { %1337 = vmatpush1.bf16.msra.mxu0 %v3205_v2  ;;  %v1555_v2 = vld [vmem:[%s3810_s28 + $0x320] sm:$0xff] }
 0x1b6   : > { %1338 = vmatprep.subr.bf16.mxu0 %v3210_v3  ;;  %v2893_v3 = vcombine.high %v1551_v1, %v1555_v2 }
 0x1b8   : > { %2247 = vmatprep.subr.bf16.mxu1 %v2893_v3 }
 0x1b9   : > { %1339 = vmatpush1.bf16.msra.mxu0 %v3208_v4  ;;  %v2892_v4 = vcombine.low %v1551_v1, %v1555_v2  ;;  %v1405_v1 = vsub.s32 %v1402_v62, %v3988_v63  ;;  %v1544_v62 = vld [vmem:[%s3810_s28 + $0x2c8] sm:$0xff] }
 0x1ba   : > { %1340 = vmatprep.subr.bf16.mxu0 %v3213_v5  ;;  %v1559_v5 = vld [vmem:[%s3810_s28 + $0x340] sm:$0xff] }
 0x1bb   : > { %2248 = vmatpush1.bf16.msra.mxu1 %v2892_v4 }
 0x1bd   : > { %1341 = vmatpush1.bf16.msra.mxu0 %v3211_v6  ;;  %v1563_v6 = vld [vmem:[%s3810_s28 + $0x360] sm:$0xff] }
 0x1be   : > { %1342 = vmatprep.subr.bf16.mxu0 %v3216_v7  ;;  %v2901_v7 = vcombine.high %v1559_v5, %v1563_v6 }
 0x1c0   : > { %2249 = vmatprep.subr.bf16.mxu1 %v2901_v7  ;;  %v3994_v7 = vsub.s32 0, %v3988_v63 }
 0x1c1   : > { %1343 = vmatpush1.bf16.msra.mxu0 %v3214_v8  ;;  %v2900_v8 = vcombine.low %v1559_v5, %v1563_v6  ;;  %v1392_v5 = vld [vmem:[%s334_s1] sm:$0x3] }
 0x1c2   : > { %1344 = vmatprep.subr.bf16.mxu0 %v3219_v9  ;;  %v1567_v9 = vld [vmem:[%s3810_s28 + $0x380] sm:$0xff] }
 0x1c3   : > { %2250 = vmatpush1.bf16.msra.mxu1 %v2900_v8  ;;  %v3997_v8 = vsub.s32 1, %v3988_v63 }
 0x1c5   : > { %1345 = vmatpush1.bf16.msra.mxu0 %v3217_v10  ;;  %v1571_v10 = vld [vmem:[%s3810_s28 + $0x3a0] sm:$0xff] }
 0x1c6   : > { %1346 = vmatprep.subr.bf16.mxu0 %v3222_v11  ;;  %v2909_v11 = vcombine.high %v1567_v9, %v1571_v10 }
 0x1c8   : > { %2251 = vmatprep.subr.bf16.mxu1 %v2909_v11 }
 0x1c9   : > { %1347 = vmatpush1.bf16.msra.mxu0 %v3220_v12  ;;  %v2908_v12 = vcombine.low %v1567_v9, %v1571_v10  ;;  %v1429_v9 = vld [vmem:[%s343_s17] sm:$0x3] }
 0x1ca   : > { %1348 = vmatprep.subr.bf16.mxu0 %v3225_v13  ;;  %v1575_v13 = vld [vmem:[%s3810_s28 + $0x3c0] sm:$0xff] }
 0x1cb   : > { %2252 = vmatpush1.bf16.msra.mxu1 %v2908_v12 }
 0x1cd   : > { %1349 = vmatpush1.bf16.msra.mxu0 %v3223_v14  ;;  %v1579_v14 = vld [vmem:[%s3810_s28 + $0x3e0] sm:$0xff] }
 0x1ce   : > { %v2917_v15 = vcombine.high %v1575_v13, %v1579_v14 }
 0x1d0   : > { %1351 = vmatmul.mubr.bf16.vlgmr.msra.gmra.mrb[0].mxu0 %v425_v16  ;;  %v2916_v16 = vcombine.low %v1575_v13, %v1579_v14  ;;  %2253 = vmatprep.subr.bf16.mxu1 %v2917_v15  ;;  %v1438_v13 = vrot.slane %v1429_v9, %v3997_v8  ;;  %v1434_v14 = vrot.slane %v1429_v9, %v3994_v7  ;;  %v1560_v9 = vld [vmem:[%s3810_s28 + $0x348] sm:$0xff] }
 0x1d2   : > { %2254 = vmatpush1.bf16.msra.mxu1 %v2916_v16 }
 0x1d3   : > { %2264 = vmatprep.subr.bf16.mxu1 %v2799_v19 }
 0x2a3   : > { %v1352_v21 = vpop.f32.mrb[0].mxu0 }
 0x2a4   : > { %v1359_v22 = vrot.slane %v1352_v21, 4  ;;  %v1354_v23 = vpop.f32.mrb[1].mxu0 }
 0x2a5   : > { %v1365_v24 = vrot.slane %v1354_v23, 4  ;;  %v1356_v25 = vpop.f32.mrb[2].mxu0 }
 0x2a6   : > { %v1360_v26 = vadd.f32 %v1359_v22, %v1352_v21  ;;  %v1357_v27 = vpop.f32.mrb[3].mxu0  ;;  %v1468_v25 = vld [vmem:[%s3810_s28 + $0x68] sm:$0xff] }
 0x2a7   : > { %v1366_v28 = vadd.f32 %v1365_v24, %v1354_v23  ;;  %v1464_v24 = vld [vmem:[%s3810_s28 + $0x48] sm:$0xff] }
 0x2a8   : > { %v1361_v29 = vrot.slane %v1360_v26, 2 }
 0x2a9   : > { %v1367_v30 = vrot.slane %v1366_v28, 2 }
 0x2aa   : > { %v1362_v31 = vadd.f32 %v1361_v29, %v1360_v26  ;;  %v1472_v29 = vld [vmem:[%s3810_s28 + $0x88] sm:$0xff] }
 0x2ab   : > { %v1368_v32 = vadd.f32 %v1367_v30, %v1366_v28  ;;  %v2807_v28 = vcombine.high %v1464_v24, %v1468_v25  ;;  %v1476_v30 = vld [vmem:[%s3810_s28 + $0xa8] sm:$0xff] }
 0x2ac   : > { %v1363_v33 = vrot.slane %v1362_v31, 1 }
 0x2ad   : > { %v1369_v34 = vrot.slane %v1368_v32, 1 }
 0x2ae   : > { %v1364_v35 = vadd.f32 %v1363_v33, %v1362_v31  ;;  %v2806_v31 = vcombine.low %v1464_v24, %v1468_v25  ;;  %v1480_v33 = vld [vmem:[%s3810_s28 + $0xc8] sm:$0xff]  ;;  %v1457_v24 = vld [vmem:[%s3810_s28 + $0x10] sm:$0xff] }
 0x2af   : > { %v1370_v36 = vadd.f32 %v1369_v34, %v1368_v32  ;;  %v2815_v32 = vcombine.high %v1472_v29, %v1476_v30  ;;  %v1484_v34 = vld [vmem:[%s3810_s28 + $0xe8] sm:$0xff]  ;;  %v1461_v25 = vld [vmem:[%s3810_s28 + $0x30] sm:$0xff] }
 0x2b0   : > { %v1372_v37 = vmul.f32 0.125, %v1364_v35  ;;  %v2814_v35 = vcombine.low %v1472_v29, %v1476_v30  ;;  %v2822_v17 = vcombine.low %v1480_v33, %v1484_v34  ;;  %v2801_v29 = vcombine.high %v1457_v24, %v1461_v25  ;;  %v1465_v30 = vld [vmem:[%s3810_s28 + $0x50] sm:$0xff] }
 0x2b1   : > { %v1373_v38 = vmul.f32 0.125, %v1370_v36  ;;  %v2823_v36 = vcombine.high %v1480_v33, %v1484_v34  ;;  %v1473_v34 = vld [vmem:[%s3810_s28 + $0x90] sm:$0xff] }
 0x2b2   : > { %v1374_v39 = vsub.f32 %v1352_v21, %v1372_v37  ;;  %v1488_v37 = vld [vmem:[%s3810_s28 + $0x108] sm:$0xff] }
 0x2b3   : > { %v1375_v40 = vsub.f32 %v1354_v23, %v1373_v38  ;;  %v1492_v38 = vld [vmem:[%s3810_s28 + $0x128] sm:$0xff] }
 0x2b4   : > { %v1376_v41 = vmul.f32 %v1374_v39, %v1374_v39  ;;  %v2831_v18 = vcombine.high %v1488_v37, %v1492_v38 }
 0x2b5   : > { %v1377_v42 = vmul.f32 %v1375_v40, %v1375_v40 }
 0x2b6   : > { %v1378_v43 = vrot.slane %v1376_v41, 4 }
 0x2b7   : > { %v1384_v44 = vrot.slane %v1377_v42, 4 }
 0x2b8   : > { %v1379_v45 = vadd.f32 %v1378_v43, %v1376_v41  ;;  %v1508_v43 = vld [vmem:[%s3810_s28 + $0x1a8] sm:$0xff] }
 0x2b9   : > { %v1385_v46 = vadd.f32 %v1384_v44, %v1377_v42  ;;  %v1504_v42 = vld [vmem:[%s3810_s28 + $0x188] sm:$0xff] }
 0x2ba   : > { %v1380_v47 = vrot.slane %v1379_v45, 2 }
 0x2bb   : > { %v1386_v48 = vrot.slane %v1385_v46, 2 }
 0x2bc   : > { %v1381_v49 = vadd.f32 %v1380_v47, %v1379_v45  ;;  %v2847_v45 = vcombine.high %v1504_v42, %v1508_v43  ;;  %v1516_v47 = vld [vmem:[%s3810_s28 + $0x1e8] sm:$0xff] }
 0x2bd   : > { %v1387_v50 = vadd.f32 %v1386_v48, %v1385_v46  ;;  %v1512_v46 = vld [vmem:[%s3810_s28 + $0x1c8] sm:$0xff]  ;;  %v2846_v48 = vcombine.low %v1504_v42, %v1508_v43  ;;  %v1497_v43 = vld [vmem:[%s3810_s28 + $0x150] sm:$0xff] }
 0x2be   : > { %v1382_v51 = vrot.slane %v1381_v49, 1 }
 0x2bf   : > { %v1388_v52 = vrot.slane %v1387_v50, 1 }
 0x2c0   : > { %v1383_v53 = vadd.f32 %v1382_v51, %v1381_v49  ;;  %v2855_v49 = vcombine.high %v1512_v46, %v1516_v47  ;;  %v1524_v51 = vld [vmem:[%s3810_s28 + $0x228] sm:$0xff] }
 0x2c1   : > { %v1389_v54 = vadd.f32 %v1388_v52, %v1387_v50  ;;  %v1520_v50 = vld [vmem:[%s3810_s28 + $0x208] sm:$0xff]  ;;  %v2854_v52 = vcombine.low %v1512_v46, %v1516_v47  ;;  %v1505_v47 = vld [vmem:[%s3810_s28 + $0x190] sm:$0xff] }
 0x2c2   : > { %v1390_v55 = vmul.f32 0.125, %v1383_v53  ;;  %v2863_v53 = vcombine.high %v1520_v50, %v1524_v51 }
 0x2c3   : > { %v1391_v56 = vmul.f32 0.125, %v1389_v54  ;;  %v1528_v54 = vld [vmem:[%s3810_s28 + $0x248] sm:$0xff] }
 0x2c4   : > { %v1393_v57 = vadd.f32 1e-05, %v1390_v55  ;;  %v1532_v55 = vld [vmem:[%s3810_s28 + $0x268] sm:$0xff] }
 0x2c5   : > { %v1394_v58 = vadd.f32 1e-05, %v1391_v56  ;;  %v2862_v56 = vcombine.low %v1520_v50, %v1524_v51  ;;  %v2870_v60 = vcombine.low %v1528_v54, %v1532_v55  ;;  %v1513_v51 = vld [vmem:[%s3810_s28 + $0x1d0] sm:$0xff] }
 0x2c6   : > { %3226 = vrsqrt.f32 %v1393_v57  ;;  %v2871_v57 = vcombine.high %v1528_v54, %v1532_v55  ;;  %v1521_v55 = vld [vmem:[%s3810_s28 + $0x210] sm:$0xff] }
 0x2c7   : > { %3228 = vrsqrt.f32 %v1394_v58  ;;  %v1536_v58 = vld [vmem:[%s3810_s28 + $0x288] sm:$0xff] }
 0x2c8   : > { %v2879_v61 = vcombine.high %v1536_v58, %v1540_v59 }
 0x2d0   : > { %v3227_v0 = vpop.eup %3226 }
 0x2d1   : > { %v3229_v2 = vpop.eup %3228 }
 0x2d2   : > { %v1399_v3 = vcombine.low %v3227_v0, %v3229_v2  ;;  %v1548_v0 = vld [vmem:[%s3810_s28 + $0x2e8] sm:$0xff] }
 0x2d3   : > { %v2887_v2 = vcombine.high %v1544_v62, %v1548_v0 }
 0x2d4   : > { %v1406_v4 = vrot.slane %v1399_v3, %v1405_v1  ;;  %v1552_v3 = vld [vmem:[%s3810_s28 + $0x308] sm:$0xff] }
 0x2d6   : > { %v1413_v6 = vrot.slane %v1406_v4, %v1405_v1  ;;  %v2878_v1 = vcombine.low %v1536_v58, %v1540_v59  ;;  %v1556_v4 = vld [vmem:[%s3810_s28 + $0x328] sm:$0xff]  ;;  %v1529_v59 = vld [vmem:[%s3810_s28 + $0x250] sm:$0xff] }
 0x2d8   : > { %v1415_v10 = vmul.f32 %v1413_v6, %v1392_v5  ;;  %v2886_v5 = vcombine.low %v1544_v62, %v1548_v0  ;;  %v2895_v6 = vcombine.high %v1552_v3, %v1556_v4  ;;  %v1537_v0 = vld [vmem:[%s3810_s28 + $0x290] sm:$0xff] }
 0x2da   : > { %v1420_v11 = vrot.slane %v1415_v10, %v3994_v7  ;;  %v1424_v12 = vrot.slane %v1415_v10, %v3997_v8  ;;  %v1564_v10 = vld [vmem:[%s3810_s28 + $0x368] sm:$0xff] }
 0x2dc   : > { %v1428_v15 = vmul.f32 %v1424_v12, %v1375_v40  ;;  %v1427_v16 = vmul.f32 %v1420_v11, %v1374_v39  ;;  %v1500_v39 = vld [vmem:[%s3810_s28 + $0x168] sm:$0xff]  ;;  %v2830_v40 = vcombine.low %v1488_v37, %v1492_v38  ;;  %v2894_v11 = vcombine.low %v1552_v3, %v1556_v4  ;;  %v1481_v38 = vld [vmem:[%s3810_s28 + $0xd0] sm:$0xff] }
 0x2dd   : > { %v2903_v12 = vcombine.high %v1560_v9, %v1564_v10  ;;  %v1545_v4 = vld [vmem:[%s3810_s28 + $0x2d0] sm:$0xff] }
 0x2de   : > { %v1442_v19 = vadd.f32 %v1438_v13, %v1428_v15  ;;  %v1441_v21 = vadd.f32 %v1434_v14, %v1427_v16  ;;  %v1568_v13 = vld [vmem:[%s3810_s28 + $0x388] sm:$0xff]  ;;  %v2902_v15 = vcombine.low %v1560_v9, %v1564_v10  ;;  %v1553_v10 = vld [vmem:[%s3810_s28 + $0x310] sm:$0xff] }
 0x2df   : > { %v1572_v14 = vld [vmem:[%s3810_s28 + $0x3a8] sm:$0xff] }
 0x2e0   : > { %v1444_v22 = vmax.f32 %v1442_v19, 0.0  ;;  %v1443_v23 = vmax.f32 %v1441_v21, 0.0  ;;  %v2911_v16 = vcombine.high %v1568_v13, %v1572_v14  ;;  %v1576_v19 = vld [vmem:[%s3810_s28 + $0x3c8] sm:$0xff] }
 0x2e1   : > { %v1580_v21 = vld [vmem:[%s3810_s28 + $0x3e8] sm:$0xff] }
 0x2e2   : > { %v4007_v26 = vpack.c.bf16 %v1444_v22, %v1444_v22  ;;  %v4009_v27 = vpack.c.bf16 %v1443_v23, %v1443_v23  ;;  %v2910_v22 = vcombine.low %v1568_v13, %v1572_v14  ;;  %v2919_v23 = vcombine.high %v1576_v19, %v1580_v21  ;;  %v1561_v14 = vld [vmem:[%s3810_s28 + $0x350] sm:$0xff] }
 0x2e4   : > { %2255 = vmatprep.mubr.bf16.mxu1 %v4007_v26 }
 0x2e5   : > { %2256 = vmatmul.mubr.bf16.vlgmr.msra.gmra.mrb[0].mxu1 %v4009_v27 }
 0x2e6   : > { %2265 = vmatpush1.bf16.msra.mxu1 %v2798_v20  ;;  %2296 = vmatprep.mubr.bf16.mxu1 %v4007_v26  ;;  %v1496_v20 = vld [vmem:[%s3810_s28 + $0x148] sm:$0xff] }
 0x2e7   : > { %2266 = vmatprep.subr.bf16.mxu1 %v2807_v28  ;;  %v2839_v41 = vcombine.high %v1496_v20, %v1500_v39  ;;  %v2838_v44 = vcombine.low %v1496_v20, %v1500_v39  ;;  %v2918_v28 = vcombine.low %v1576_v19, %v1580_v21  ;;  %v1489_v39 = vld [vmem:[%s3810_s28 + $0x110] sm:$0xff] }
 0x2e8   : > { %v1569_v21 = vld [vmem:[%s3810_s28 + $0x390] sm:$0xff] }
 0x2ea   : > { %2267 = vmatpush1.bf16.msra.mxu1 %v2806_v31  ;;  %v1469_v31 = vld [vmem:[%s3810_s28 + $0x70] sm:$0xff] }
 0x2eb   : > { %2268 = vmatprep.subr.bf16.mxu1 %v2815_v32  ;;  %v2800_v32 = vcombine.low %v1457_v24, %v1461_v25  ;;  %v2809_v33 = vcombine.high %v1465_v30, %v1469_v31  ;;  %v1577_v25 = vld [vmem:[%s3810_s28 + $0x3d0] sm:$0xff] }
 0x2ee   : > { %2269 = vmatpush1.bf16.msra.mxu1 %v2814_v35  ;;  %v1477_v35 = vld [vmem:[%s3810_s28 + $0xb0] sm:$0xff] }
 0x2ef   : > { %2270 = vmatprep.subr.bf16.mxu1 %v2823_v36  ;;  %v2808_v36 = vcombine.low %v1465_v30, %v1469_v31  ;;  %v2817_v37 = vcombine.high %v1473_v34, %v1477_v35  ;;  %v1458_v31 = vld [vmem:[%s3810_s28 + $0x18] sm:$0xff] }
 0x2f2   : > { %2271 = vmatpush1.bf16.msra.mxu1 %v2822_v17  ;;  %v1485_v17 = vld [vmem:[%s3810_s28 + $0xf0] sm:$0xff] }
 0x2f3   : > { %2272 = vmatprep.subr.bf16.mxu1 %v2831_v18  ;;  %v2816_v18 = vcombine.low %v1473_v34, %v1477_v35  ;;  %v2825_v20 = vcombine.high %v1481_v38, %v1485_v17  ;;  %v1466_v35 = vld [vmem:[%s3810_s28 + $0x58] sm:$0xff] }
 0x2f6   : > { %2273 = vmatpush1.bf16.msra.mxu1 %v2830_v40  ;;  %v1493_v40 = vld [vmem:[%s3810_s28 + $0x130] sm:$0xff] }
 0x2f7   : > { %2274 = vmatprep.subr.bf16.mxu1 %v2839_v41  ;;  %v2824_v41 = vcombine.low %v1481_v38, %v1485_v17  ;;  %v2833_v42 = vcombine.high %v1489_v39, %v1493_v40  ;;  %v1474_v17 = vld [vmem:[%s3810_s28 + $0x98] sm:$0xff] }
 0x2fa   : > { %2275 = vmatpush1.bf16.msra.mxu1 %v2838_v44  ;;  %v1501_v44 = vld [vmem:[%s3810_s28 + $0x170] sm:$0xff] }
 0x2fb   : > { %2276 = vmatprep.subr.bf16.mxu1 %v2847_v45  ;;  %v2832_v45 = vcombine.low %v1489_v39, %v1493_v40  ;;  %v2841_v46 = vcombine.high %v1497_v43, %v1501_v44  ;;  %v1482_v40 = vld [vmem:[%s3810_s28 + $0xd8] sm:$0xff] }
 0x2fe   : > { %2277 = vmatpush1.bf16.msra.mxu1 %v2846_v48  ;;  %v1509_v48 = vld [vmem:[%s3810_s28 + $0x1b0] sm:$0xff] }
 0x2ff   : > { %2278 = vmatprep.subr.bf16.mxu1 %v2855_v49  ;;  %v2840_v49 = vcombine.low %v1497_v43, %v1501_v44  ;;  %v2849_v50 = vcombine.high %v1505_v47, %v1509_v48  ;;  %v1490_v44 = vld [vmem:[%s3810_s28 + $0x118] sm:$0xff] }
 0x302   : > { %2279 = vmatpush1.bf16.msra.mxu1 %v2854_v52  ;;  %v1517_v52 = vld [vmem:[%s3810_s28 + $0x1f0] sm:$0xff] }
 0x303   : > { %2280 = vmatprep.subr.bf16.mxu1 %v2863_v53  ;;  %v2848_v53 = vcombine.low %v1505_v47, %v1509_v48  ;;  %v2857_v54 = vcombine.high %v1513_v51, %v1517_v52  ;;  %v1498_v47 = vld [vmem:[%s3810_s28 + $0x158] sm:$0xff] }
 0x304   : > { %v1502_v48 = vld [vmem:[%s3810_s28 + $0x178] sm:$0xff] }
 0x306   : > { %2281 = vmatpush1.bf16.msra.mxu1 %v2862_v56  ;;  %v1525_v56 = vld [vmem:[%s3810_s28 + $0x230] sm:$0xff] }
 0x307   : > { %2282 = vmatprep.subr.bf16.mxu1 %v2871_v57  ;;  %v2856_v57 = vcombine.low %v1513_v51, %v1517_v52  ;;  %v2865_v58 = vcombine.high %v1521_v55, %v1525_v56  ;;  %v1506_v51 = vld [vmem:[%s3810_s28 + $0x198] sm:$0xff] }
 0x308   : > { %v1510_v52 = vld [vmem:[%s3810_s28 + $0x1b8] sm:$0xff] }
 0x30a   : > { %2283 = vmatpush1.bf16.msra.mxu1 %v2870_v60  ;;  %v1533_v60 = vld [vmem:[%s3810_s28 + $0x270] sm:$0xff] }
 0x30b   : > { %2284 = vmatprep.subr.bf16.mxu1 %v2879_v61  ;;  %v2864_v61 = vcombine.low %v1521_v55, %v1525_v56  ;;  %v2873_v62 = vcombine.high %v1529_v59, %v1533_v60  ;;  %v1514_v55 = vld [vmem:[%s3810_s28 + $0x1d8] sm:$0xff] }
 0x30c   : > { %v1518_v56 = vld [vmem:[%s3810_s28 + $0x1f8] sm:$0xff] }
 0x30e   : > { %2285 = vmatpush1.bf16.msra.mxu1 %v2878_v1  ;;  %v1541_v1 = vld [vmem:[%s3810_s28 + $0x2b0] sm:$0xff] }
 0x30f   : > { %2286 = vmatprep.subr.bf16.mxu1 %v2887_v2  ;;  %v2872_v2 = vcombine.low %v1529_v59, %v1533_v60  ;;  %v2881_v3 = vcombine.high %v1537_v0, %v1541_v1  ;;  %v1522_v59 = vld [vmem:[%s3810_s28 + $0x218] sm:$0xff] }
 0x310   : > { %v1526_v60 = vld [vmem:[%s3810_s28 + $0x238] sm:$0xff] }
 0x312   : > { %2287 = vmatpush1.bf16.msra.mxu1 %v2886_v5  ;;  %v1549_v5 = vld [vmem:[%s3810_s28 + $0x2f0] sm:$0xff] }
 0x313   : > { %2288 = vmatprep.subr.bf16.mxu1 %v2895_v6  ;;  %v2880_v6 = vcombine.low %v1537_v0, %v1541_v1  ;;  %v2889_v9 = vcombine.high %v1545_v4, %v1549_v5  ;;  %v1530_v0 = vld [vmem:[%s3810_s28 + $0x258] sm:$0xff] }
 0x314   : > { %v1534_v1 = vld [vmem:[%s3810_s28 + $0x278] sm:$0xff] }
 0x316   : > { %2289 = vmatpush1.bf16.msra.mxu1 %v2894_v11  ;;  %v1557_v11 = vld [vmem:[%s3810_s28 + $0x330] sm:$0xff] }
 0x317   : > { %2290 = vmatprep.subr.bf16.mxu1 %v2903_v12  ;;  %v2888_v12 = vcombine.low %v1545_v4, %v1549_v5  ;;  %v2897_v13 = vcombine.high %v1553_v10, %v1557_v11  ;;  %v1538_v4 = vld [vmem:[%s3810_s28 + $0x298] sm:$0xff] }
 0x318   : > { %v1542_v5 = vld [vmem:[%s3810_s28 + $0x2b8] sm:$0xff] }
 0x31a   : > { %2291 = vmatpush1.bf16.msra.mxu1 %v2902_v15  ;;  %v1565_v15 = vld [vmem:[%s3810_s28 + $0x370] sm:$0xff] }
 0x31b   : > { %2292 = vmatprep.subr.bf16.mxu1 %v2911_v16  ;;  %v2896_v16 = vcombine.low %v1553_v10, %v1557_v11  ;;  %v2905_v19 = vcombine.high %v1561_v14, %v1565_v15  ;;  %v1546_v10 = vld [vmem:[%s3810_s28 + $0x2d8] sm:$0xff] }
 0x31c   : > { %v1550_v11 = vld [vmem:[%s3810_s28 + $0x2f8] sm:$0xff] }
 0x31e   : > { %2293 = vmatpush1.bf16.msra.mxu1 %v2910_v22  ;;  %v1573_v22 = vld [vmem:[%s3810_s28 + $0x3b0] sm:$0xff] }
 0x31f   : > { %2294 = vmatprep.subr.bf16.mxu1 %v2919_v23  ;;  %v2904_v23 = vcombine.low %v1561_v14, %v1565_v15  ;;  %v2913_v24 = vcombine.high %v1569_v21, %v1573_v22  ;;  %v1554_v14 = vld [vmem:[%s3810_s28 + $0x318] sm:$0xff] }
 0x320   : > { %v1558_v15 = vld [vmem:[%s3810_s28 + $0x338] sm:$0xff] }
 0x322   : > { %2295 = vmatpush1.bf16.msra.mxu1 %v2918_v28  ;;  %v1581_v28 = vld [vmem:[%s3810_s28 + $0x3f0] sm:$0xff] }
 0x323   : > { %2305 = vmatprep.subr.bf16.mxu1 %v2801_v29  ;;  %v2912_v29 = vcombine.low %v1569_v21, %v1573_v22  ;;  %v2921_v30 = vcombine.high %v1577_v25, %v1581_v28  ;;  %v1562_v21 = vld [vmem:[%s3810_s28 + $0x358] sm:$0xff] }
 0x324   : > { %v1566_v22 = vld [vmem:[%s3810_s28 + $0x378] sm:$0xff] }
 0x325   : > { %2297 = vmatmul.mubr.bf16.vlgmr.msra.gmra.mrb[4].mxu1 %v4009_v27 }
 0x326   : > { %2306 = vmatpush1.bf16.msra.mxu1 %v2800_v32  ;;  %2337 = vmatprep.mubr.bf16.mxu1 %v4007_v26  ;;  %v1462_v32 = vld [vmem:[%s3810_s28 + $0x38] sm:$0xff] }
 0x327   : > { %2307 = vmatprep.subr.bf16.mxu1 %v2809_v33  ;;  %v2920_v33 = vcombine.low %v1577_v25, %v1581_v28  ;;  %v2803_v34 = vcombine.high %v1458_v31, %v1462_v32  ;;  %v1570_v25 = vld [vmem:[%s3810_s28 + $0x398] sm:$0xff] }
 0x328   : > { %v1574_v28 = vld [vmem:[%s3810_s28 + $0x3b8] sm:$0xff] }
 0x32a   : > { %2308 = vmatpush1.bf16.msra.mxu1 %v2808_v36  ;;  %v1470_v36 = vld [vmem:[%s3810_s28 + $0x78] sm:$0xff] }
 0x32b   : > { %2309 = vmatprep.subr.bf16.mxu1 %v2817_v37  ;;  %v2802_v37 = vcombine.low %v1458_v31, %v1462_v32  ;;  %v2811_v38 = vcombine.high %v1466_v35, %v1470_v36  ;;  %v1578_v31 = vld [vmem:[%s3810_s28 + $0x3d8] sm:$0xff] }
 0x32c   : > { %v1582_v32 = vld [vmem:[%s3810_s28 + $0x3f8] sm:$0xff] }
 0x32e   : > { %2310 = vmatpush1.bf16.msra.mxu1 %v2816_v18  ;;  %v1478_v18 = vld [vmem:[%s3810_s28 + $0xb8] sm:$0xff] }
 0x32f   : > { %2311 = vmatprep.subr.bf16.mxu1 %v2825_v20  ;;  %v2810_v20 = vcombine.low %v1466_v35, %v1470_v36  ;;  %v2819_v39 = vcombine.high %v1474_v17, %v1478_v18  ;;  %v2922_v35 = vcombine.low %v1578_v31, %v1582_v32  ;;  %v1445_v36 = vld [vmem:[#allocation2] sm:$0xff] }
 0x332   : > { %2312 = vmatpush1.bf16.msra.mxu1 %v2824_v41  ;;  %v1486_v41 = vld [vmem:[%s3810_s28 + $0xf8] sm:$0xff] }
 0x333   : > { %2313 = vmatprep.subr.bf16.mxu1 %v2833_v42  ;;  %v2818_v42 = vcombine.low %v1474_v17, %v1478_v18  ;;  %v2827_v43 = vcombine.high %v1482_v40, %v1486_v41 }
 0x336   : > { %2314 = vmatpush1.bf16.msra.mxu1 %v2832_v45  ;;  %v1494_v45 = vld [vmem:[%s3810_s28 + $0x138] sm:$0xff] }
 0x337   : > { %2315 = vmatprep.subr.bf16.mxu1 %v2841_v46  ;;  %v2826_v46 = vcombine.low %v1482_v40, %v1486_v41  ;;  %v1447_v41 = vld [vmem:[#allocation2 + $0x10] sm:$0xff] }
 0x33a   : > { %2316 = vmatpush1.bf16.msra.mxu1 %v2840_v49  ;;  %v2834_v49 = vcombine.low %v1490_v44, %v1494_v45 }
 0x33b   : > { %2317 = vmatprep.subr.bf16.mxu1 %v2849_v50  ;;  %v2843_v50 = vcombine.high %v1498_v47, %v1502_v48 }
 0x33e   : > { %2318 = vmatpush1.bf16.msra.mxu1 %v2848_v53  ;;  %v2842_v53 = vcombine.low %v1498_v47, %v1502_v48  ;;  %v1450_v48 = vld [vmem:[#allocation2 + $0x28] sm:$0xff] }
 0x33f   : > { %2319 = vmatprep.subr.bf16.mxu1 %v2857_v54  ;;  %v2851_v54 = vcombine.high %v1506_v51, %v1510_v52 }
 0x342   : > { %2320 = vmatpush1.bf16.msra.mxu1 %v2856_v57  ;;  %v2850_v57 = vcombine.low %v1506_v51, %v1510_v52 }
 0x343   : > { %2321 = vmatprep.subr.bf16.mxu1 %v2865_v58  ;;  %v2859_v58 = vcombine.high %v1514_v55, %v1518_v56 }
 0x346   : > { %2322 = vmatpush1.bf16.msra.mxu1 %v2864_v61  ;;  %v2858_v61 = vcombine.low %v1514_v55, %v1518_v56  ;;  %v1451_v55 = vld [vmem:[#allocation2 + $0x30] sm:$0xff]  ;;  %v1452_v56 = vld [vmem:[#allocation2 + $0x38] sm:$0xff] }
 0x347   : > { %2323 = vmatprep.subr.bf16.mxu1 %v2873_v62  ;;  %v2867_v62 = vcombine.high %v1522_v59, %v1526_v60 }
 0x34a   : > { %2324 = vmatpush1.bf16.msra.mxu1 %v2872_v2  ;;  %v2866_v2 = vcombine.low %v1522_v59, %v1526_v60 }
 0x34b   : > { %2325 = vmatprep.subr.bf16.mxu1 %v2881_v3  ;;  %v2875_v3 = vcombine.high %v1530_v0, %v1534_v1 }
 0x34e   : > { %2326 = vmatpush1.bf16.msra.mxu1 %v2880_v6  ;;  %v2874_v6 = vcombine.low %v1530_v0, %v1534_v1  ;;  %v2427_v0 = vsub.s32 (!%p2924_p1), 2, %v3988_v63  ;;  %v2431_v1 = vsub.s32 (!%p2924_p1), 3, %v3988_v63 }
 0x34f   : > { %2327 = vmatprep.subr.bf16.mxu1 %v2889_v9  ;;  %v2883_v9 = vcombine.high %v1538_v4, %v1542_v5 }
 0x352   : > { %2328 = vmatpush1.bf16.msra.mxu1 %v2888_v12  ;;  %v2882_v12 = vcombine.low %v1538_v4, %v1542_v5  ;;  %v2439_v5 = vsub.s32 (!%p2924_p1), 5, %v3988_v63 }
 0x353   : > { %2329 = vmatprep.subr.bf16.mxu1 %v2897_v13  ;;  %v2891_v13 = vcombine.high %v1546_v10, %v1550_v11 }
 0x356   : > { %2330 = vmatpush1.bf16.msra.mxu1 %v2896_v16  ;;  %v2890_v16 = vcombine.low %v1546_v10, %v1550_v11  ;;  %v2415_v10 = vld [vmem:[#allocation12] sm:$0xff] (!%p2924_p1)  ;;  %v2443_v11 = vsub.s32 (!%p2924_p1), 6, %v3988_v63 }
 0x357   : > { %2331 = vmatprep.subr.bf16.mxu1 %v2905_v19  ;;  %v2899_v19 = vcombine.high %v1554_v14, %v1558_v15 }
 0x35a   : > { %2332 = vmatpush1.bf16.msra.mxu1 %v2904_v23  ;;  %v2898_v23 = vcombine.low %v1554_v14, %v1558_v15  ;;  %v2428_v14 = vrot.slane (!%p2924_p1), %v2415_v10, %v2427_v0  ;;  %v2432_v15 = vrot.slane (!%p2924_p1), %v2415_v10, %v2431_v1 }
 0x35b   : > { %2333 = vmatprep.subr.bf16.mxu1 %v2913_v24  ;;  %v2907_v24 = vcombine.high %v1562_v21, %v1566_v22 }
 0x35e   : > { %2334 = vmatpush1.bf16.msra.mxu1 %v2912_v29  ;;  %v2906_v29 = vcombine.low %v1562_v21, %v1566_v22  ;;  %v2440_v21 = vrot.slane (!%p2924_p1), %v2415_v10, %v2439_v5  ;;  %v2447_v22 = vsub.s32 (!%p2924_p1), 7, %v3988_v63 }
 0x35f   : > { %2335 = vmatprep.subr.bf16.mxu1 %v2921_v30  ;;  %v2915_v30 = vcombine.high %v1570_v25, %v1574_v28 }
 0x362   : > { %2336 = vmatpush1.bf16.msra.mxu1 %v2920_v33  ;;  %v2914_v33 = vcombine.low %v1570_v25, %v1574_v28 }
 0x363   : > { %2346 = vmatprep.subr.bf16.mxu1 %v2803_v34  ;;  %v2923_v34 = vcombine.high %v1578_v31, %v1582_v32 }
 0x365   : > { %2338 = vmatmul.mubr.bf16.vlgmr.msra.gmra.mrb[8].mxu1 %v4009_v27 }
 0x366   : > { %2347 = vmatpush1.bf16.msra.mxu1 %v2802_v37  ;;  %2378 = vmatprep.mubr.bf16.mxu1 %v4007_v26  ;;  %v2835_v26 = vcombine.high %v1490_v44, %v1494_v45  ;;  %v1446_v37 = vld [vmem:[#allocation2 + $0x8] sm:$0xff] }
 0x367   : > { %2348 = vmatprep.subr.bf16.mxu1 %v2811_v38 }
 0x36a   : > { %2349 = vmatpush1.bf16.msra.mxu1 %v2810_v20 }
 0x36b   : > { %2350 = vmatprep.subr.bf16.mxu1 %v2819_v39 }
 0x36e   : > { %2351 = vmatpush1.bf16.msra.mxu1 %v2818_v42  ;;  %v1448_v42 = vld [vmem:[#allocation2 + $0x18] sm:$0xff] }
 0x36f   : > { %2352 = vmatprep.subr.bf16.mxu1 %v2827_v43 }
 0x372   : > { %2353 = vmatpush1.bf16.msra.mxu1 %v2826_v46 }
 0x373   : > { %2354 = vmatprep.subr.bf16.mxu1 %v2835_v26 }
 0x376   : > { %2355 = vmatpush1.bf16.msra.mxu1 %v2834_v49 }
 0x377   : > { %2356 = vmatprep.subr.bf16.mxu1 %v2843_v50 }
 0x37a   : > { %2357 = vmatpush1.bf16.msra.mxu1 %v2842_v53 }
 0x37b   : > { %2358 = vmatprep.subr.bf16.mxu1 %v2851_v54 }
 0x37e   : > { %2359 = vmatpush1.bf16.msra.mxu1 %v2850_v57 }
 0x37f   : > { %2360 = vmatprep.subr.bf16.mxu1 %v2859_v58 }
 0x382   : > { %2361 = vmatpush1.bf16.msra.mxu1 %v2858_v61 }
 0x383   : > { %2362 = vmatprep.subr.bf16.mxu1 %v2867_v62 }
 0x386   : > { %2363 = vmatpush1.bf16.msra.mxu1 %v2866_v2  ;;  %v2435_v2 = vsub.s32 (!%p2924_p1), 4, %v3988_v63 }
 0x387   : > { %2364 = vmatprep.subr.bf16.mxu1 %v2875_v3 }
 0x38a   : > { %2365 = vmatpush1.bf16.msra.mxu1 %v2874_v6 }
 0x38b   : > { %2366 = vmatprep.subr.bf16.mxu1 %v2883_v9 }
 0x38e   : > { %2367 = vmatpush1.bf16.msra.mxu1 %v2882_v12  ;;  %v2420_v12 = vrot.slane (!%p2924_p1), %v2415_v10, %v3994_v7 }
 0x38f   : > { %2368 = vmatprep.subr.bf16.mxu1 %v2891_v13  ;;  %v2424_v13 = vrot.slane (!%p2924_p1), %v2415_v10, %v3997_v8 }
 0x392   : > { %2369 = vmatpush1.bf16.msra.mxu1 %v2890_v16 }
 0x393   : > { %2370 = vmatprep.subr.bf16.mxu1 %v2899_v19  ;;  %v2436_v19 = vrot.slane (!%p2924_p1), %v2415_v10, %v2435_v2 }
 0x396   : > { %2371 = vmatpush1.bf16.msra.mxu1 %v2898_v23 }
 0x397   : > { %2372 = vmatprep.subr.bf16.mxu1 %v2907_v24 }
 0x39a   : > { %2373 = vmatpush1.bf16.msra.mxu1 %v2906_v29 }
 0x39b   : > { %2374 = vmatprep.subr.bf16.mxu1 %v2915_v30  ;;  %v2444_v30 = vrot.slane (!%p2924_p1), %v2415_v10, %v2443_v11 }
 0x39e   : > { %2375 = vmatpush1.bf16.msra.mxu1 %v2914_v33 }
 0x39f   : > { %2376 = vmatprep.subr.bf16.mxu1 %v2923_v34 }
 0x3a2   : > { %2377 = vmatpush1.bf16.msra.mxu1 %v2922_v35  ;;  %v2448_v35 = vrot.slane (!%p2924_p1), %v2415_v10, %v2447_v22 }
 0x3a5   : > { %2379 = vmatmul.mubr.bf16.vlgmr.msra.gmra.mrb[12].mxu1 %v4009_v27  ;;  %v1449_v27 = vld [vmem:[#allocation2 + $0x20] sm:$0xff] }
 0x3b8   : > { %v2257_v38 = vpop.f32.mrb[0].mxu1 }
 0x3b9   : > { %v2387_v17 = vadd.f32 %v2257_v38, %v1445_v36  ;;  %v2259_v18 = vpop.f32.mrb[1].mxu1 }
 0x3ba   : > { %v2388_v20 = vadd.f32 %v2259_v18, %v1446_v37  ;;  %v2261_v39 = vpop.f32.mrb[2].mxu1 }
 0x3bb   : > { %2395 = vst [vmem:[#allocation2] sm:$0xff] %v2387_v17  ;;  %v2262_v40 = vpop.f32.mrb[3].mxu1 }
 0x3bc   : > { %2396 = vst [vmem:[#allocation2 + $0x8] sm:$0xff] %v2388_v20 }
 0x3c2   : > { %v2407_v3 = vld [vmem:[#allocation2] sm:$0xff] (!%p2924_p1) }
 0x3c3   : > { %v2408_v4 = vld [vmem:[#allocation2 + $0x8] sm:$0xff] (!%p2924_p1)  ;;  %v2457_v23 = vadd.f32 (!%p2924_p1), %v2420_v12, %v2407_v3 }
 0x3c4   : > { %v2458_v24 = vadd.f32 (!%p2924_p1), %v2424_v13, %v2408_v4 }
 0x3c5   : > { %v2465_v32 = vmul.f32 (!%p2924_p1), %v2457_v23, %v2457_v23 }
 0x3c6   : > { %v2466_v33 = vmul.f32 (!%p2924_p1), %v2458_v24, %v2458_v24 }
 0x3c8   : > { %v2473_v37 = vadd.f32 (!%p2924_p1), %v2466_v33, %v2465_v32 }
 0x3f8   : > { %v2298_v43 = vpop.f32.mrb[4].mxu1 }
 0x3f9   : > { %v2389_v44 = vadd.f32 %v2298_v43, %v1447_v41  ;;  %v2300_v45 = vpop.f32.mrb[5].mxu1 }
 0x3fa   : > { %v2390_v46 = vadd.f32 %v2300_v45, %v1448_v42  ;;  %v2302_v26 = vpop.f32.mrb[6].mxu1 }
 0x3fb   : > { %2397 = vst [vmem:[#allocation2 + $0x10] sm:$0xff] %v2389_v44  ;;  %v2303_v47 = vpop.f32.mrb[7].mxu1 }
 0x3fc   : > { %2398 = vst [vmem:[#allocation2 + $0x18] sm:$0xff] %v2390_v46 }
 0x402   : > { %v2409_v6 = vld [vmem:[#allocation2 + $0x10] sm:$0xff] (!%p2924_p1) }
 0x403   : > { %v2410_v9 = vld [vmem:[#allocation2 + $0x18] sm:$0xff] (!%p2924_p1)  ;;  %v2459_v25 = vadd.f32 (!%p2924_p1), %v2428_v14, %v2409_v6 }
 0x404   : > { %v2460_v28 = vadd.f32 (!%p2924_p1), %v2432_v15, %v2410_v9 }
 0x405   : > { %v2467_v34 = vmul.f32 (!%p2924_p1), %v2459_v25, %v2459_v25 }
 0x406   : > { %v2468_v36 = vmul.f32 (!%p2924_p1), %v2460_v28, %v2460_v28 }
 0x407   : > { %v2474_v20 = vadd.f32 (!%p2924_p1), %v2473_v37, %v2467_v34 }
 0x409   : > { %v2475_v40 = vadd.f32 (!%p2924_p1), %v2474_v20, %v2468_v36 }
 0x438   : > { %v2339_v49 = vpop.f32.mrb[8].mxu1 }
 0x439   : > { %v2391_v50 = vadd.f32 %v2339_v49, %v1449_v27  ;;  %v2341_v51 = vpop.f32.mrb[9].mxu1 }
 0x43a   : > { %v2392_v52 = vadd.f32 %v2341_v51, %v1450_v48  ;;  %v2343_v53 = vpop.f32.mrb[10].mxu1 }
 0x43b   : > { %2399 = vst [vmem:[#allocation2 + $0x20] sm:$0xff] %v2391_v50  ;;  %v2344_v54 = vpop.f32.mrb[11].mxu1 }
 0x43c   : > { %2400 = vst [vmem:[#allocation2 + $0x28] sm:$0xff] %v2392_v52 }
 0x442   : > { %v2411_v16 = vld [vmem:[#allocation2 + $0x20] sm:$0xff] (!%p2924_p1) }
 0x443   : > { %v2412_v29 = vld [vmem:[#allocation2 + $0x28] sm:$0xff] (!%p2924_p1)  ;;  %v2461_v31 = vadd.f32 (!%p2924_p1), %v2436_v19, %v2411_v16 }
 0x444   : > { %v2462_v8 = vadd.f32 (!%p2924_p1), %v2440_v21, %v2412_v29 }
 0x445   : > { %v2469_v18 = vmul.f32 (!%p2924_p1), %v2461_v31, %v2461_v31 }
 0x446   : > { %v2470_v39 = vmul.f32 (!%p2924_p1), %v2462_v8, %v2462_v8 }
 0x447   : > { %v2476_v42 = vadd.f32 (!%p2924_p1), %v2475_v40, %v2469_v18 }
 0x449   : > { %v2477_v44 = vadd.f32 (!%p2924_p1), %v2476_v42, %v2470_v39 }
 0x476   : > { %2406 = sbr.rel (%p2924_p1) target bundleno = 1324 (0x52c), region = 76 }
 0x478   : > { %v2380_v57 = vpop.f32.mrb[12].mxu1 }
 0x479   : > { %v2393_v58 = vadd.f32 %v2380_v57, %v1451_v55  ;;  %v2382_v59 = vpop.f32.mrb[13].mxu1 }
 0x47a   : > { %v2394_v60 = vadd.f32 %v2382_v59, %v1452_v56  ;;  %v2384_v61 = vpop.f32.mrb[14].mxu1 }
 0x47b   : > { %2401 = vst [vmem:[#allocation2 + $0x30] sm:$0xff] %v2393_v58  ;;  %v2385_v62 = vpop.f32.mrb[15].mxu1 }
 0x47c   : > { %2402 = vst [vmem:[#allocation2 + $0x38] sm:$0xff] %v2394_v60 }
 0x482   : > { %v2413_v7 = vld [vmem:[#allocation2 + $0x30] sm:$0xff] }
 0x483   : > { %v2414_v38 = vld [vmem:[#allocation2 + $0x38] sm:$0xff]  ;;  %v2463_v17 = vadd.f32 %v2444_v30, %v2413_v7 }
 0x484   : > { %v2464_v63 = vadd.f32 %v2448_v35, %v2414_v38 }
 0x485   : > { %v2471_v41 = vmul.f32 %v2463_v17, %v2463_v17 }
 0x486   : > { %v2472_v43 = vmul.f32 %v2464_v63, %v2464_v63 }
 0x487   : > { %v2478_v45 = vadd.f32 %v2477_v44, %v2471_v41 }
 0x489   : > { %v2479_v46 = vadd.f32 %v2478_v45, %v2472_v43 }
 0x48b   : > { %2480 = vadd.xlane.f32.xlu0 %v2479_v46 }
 0x518   : > { %v2481_v26 = vpop.xlane.xlu0 %2480 }
 0x519   : > { %v2482_v47 = vmax.f32 %v2481_v26, 1e-24 }
 0x51b   : > { %3230 = vrsqrt.f32 %v2482_v47 }
 0x525   : > { %v3231_v27 = vpop.eup %3230 }
 0x526   : > { %v2484_v48 = vmul.f32 %v3231_v27, %v2457_v23  ;;  %v2485_v49 = vmul.f32 %v3231_v27, %v2458_v24  ;;  %v2486_v50 = vmul.f32 %v3231_v27, %v2459_v25  ;;  %v2487_v51 = vmul.f32 %v3231_v27, %v2460_v28 }
 0x527   : > { %v2488_v52 = vmul.f32 %v3231_v27, %v2461_v31  ;;  %v2489_v53 = vmul.f32 %v3231_v27, %v2462_v8  ;;  %v2490_v54 = vmul.f32 %v3231_v27, %v2463_v17  ;;  %v2491_v55 = vmul.f32 %v3231_v27, %v2464_v63 }
 0x528   : > { %2492 = vst [vmem:[#allocation14] sm:$0xff] %v2484_v48  ;;  %2493 = vst [vmem:[#allocation14 + $0x8] sm:$0xff] %v2485_v49 }
 0x529   : > { %2494 = vst [vmem:[#allocation14 + $0x10] sm:$0xff] %v2486_v50  ;;  %2495 = vst [vmem:[#allocation14 + $0x18] sm:$0xff] %v2487_v51 }
 0x52a   : > { %2496 = vst [vmem:[#allocation14 + $0x20] sm:$0xff] %v2488_v52  ;;  %2497 = vst [vmem:[#allocation14 + $0x28] sm:$0xff] %v2489_v53 }
 0x52b   : > { %2498 = vst [vmem:[#allocation14 + $0x30] sm:$0xff] %v2490_v54  ;;  %2499 = vst [vmem:[#allocation14 + $0x38] sm:$0xff] %v2491_v55 }
 0x52c PF: > { %p2991_p8 = scmp.eq.s32.totalorder %s3654_s13, 3  ;;  %s3498_s19 = smov [#allocation14]  }
 0x52d   : > { %s2507_s26 = sshll.u32 %s3498_s19, 4  ;;  %s2508_s26 = int_to_ptr.vmem [resolvable:$true] %s2507_s26 }
 0x52e   : > { %s3408_s24 = scalar_lea.vmem %s2508_s26, 1024  ;;  %p3415_p4 = scmp.lt.s32.totalorder %s2508_s26, %s2508_s26 }
 0x52f   : > { %p3409_p11 = scmp.ne.s32.totalorder %s2508_s26, %s3408_s24  ;;  %p3416_p10 = scmp.lt.s32.totalorder %s3408_s24, %s3408_s24 }
 0x531   : > { %p3410_p6 = pnand %p3409_p11, %p2991_p8  ;;  %p3417_p7 = por %p3416_p10, %p3415_p4 }
 0x533   : > { %p3411_p0 = pneg %p3410_p6 }
 0x535   : > { %p3418_p3 = pnand %p3417_p7, %p3411_p0 }
 0x537   : > { %3421 = shalt.err (!%p3418_p3)
}
 0x538   : > { %s3422_s10 = scalar_lea.hbm %s4165_s6, 1024 }
 0x539   : > { %p3423_p9 = scmp.ne.s32.totalorder %s4165_s6, %s3422_s10  ;;  %p3428_p2 = scmp.lt.u32.totalorder %s3422_s10, %s4165_s6 }
 0x53b   : > { %p3424_p12 = pnand %p3423_p9, %p2991_p8 }
 0x53d   : > { %p3425_p13 = pneg %p3424_p12 }
 0x53f   : > { %p3430_p5 = pnand %p3428_p2, %p3425_p13 }
 0x541   : > { %3433 = shalt.err (!%p3430_p5)
}
 0x542   : > { %2963 = dma.vmem_to_hbm [thread:$0]  (%p2991_p8), %s2508_s26, 1024, %s4165_s6, [#allocation5]  }
 0x543   : > { %3467 = dma.done.wait (%p2991_p8), [#allocation5], 1024  }
 0x544   : > { %3469 = vsyncadd (%p2991_p8), [#allocation5], 4294966272 }
 0x545 PF: > { %s4196_s18 = sld [smem:[#allocation20_spill]]  ;;  %p22_p1 = scmp.ge.s32.totalorder %s3555_s25, 6  }
 0x546   : > { %s4197_s21 = smov %s3476_s22  ;;  %s4198_s22 = smov %s3480_s23 }
 0x547   : > { %s4200_s24 = smov %s3555_s25  ;;  %24 = sbr.rel (!%p22_p1) target bundleno = 11 (0xb), region = 133 }
 0x54b   : > { %s4199_s23 = smov %s4196_s18 }
 0x54e   :  { %2520 = vsyncpa [#allocation4], 1 }
 0x54f   :  { %2522 = vsyncpa [#allocation4 + $0x1], 1 }
 0x550   :  { %2523 = vsyncpa [#allocation7], 1 }
 0x551   :  { %2525 = vsyncpa [#allocation7 + $0x1], 1 }
 0x552   :  { %2526 = vsyncpa [#allocation10], 1 }
 0x553   :  { %2528 = vsyncpa [#allocation10 + $0x1], 1 }
 0x554   :  { %2529 = vsyncpa [#allocation13], 1 }
 0x555   :  { %2530 = vsyncpa [#allocation5], 1 }
 0x556   :  { %2532 = vsyncpa [#allocation5 + $0x1], 1 }

</bundles_post_ra>
